<compile_context>
chip_gen: v6e
topology: v6e:2x2x1
jax: 0.10.0
libtpu: 0.0.40
codegen_flags: <defaults>
</compile_context>

<pallas_src>
import functools

import numpy as np

import jax
import jax.numpy as jnp
from jax import lax
from jax.experimental import pallas as pl
from jax.experimental.pallas import tpu as pltpu

BN_EPS = 1e-5


def _split_channels(num_channels, num_groups):
    split = [num_channels // num_groups for _ in range(num_groups)]
    split[0] += num_channels - sum(split)
    return split


# ---------------------------------------------------------------------------
# Fused MixNetBlock kernel.
# One grid step == imgs_per_step images, activations lane-packed as
# (rows = imgs * H, lanes = W * C) with the channel index fastest in the lane.
# ---------------------------------------------------------------------------
def _mixnet_fused_kernel(*refs, W, E, Kmax, BH, expand, residual):
    idx = 0
    x_ref = refs[idx]; idx += 1                                   # (BH, W*Cin) bf16
    if expand:
        w_exp_ref, es_ref, eb_ref, ea_ref = refs[idx:idx + 4]
        idx += 4
    w_dw_ref, rmask_ref, ds_ref, db_ref, da_ref = refs[idx:idx + 5]
    idx += 5
    w_proj_ref, ps_ref, pb_ref = refs[idx:idx + 3]
    idx += 3
    o_ref = refs[idx]                                             # (BH, W*Cout) bf16

    pad = Kmax // 2
    WE = W * E

    # ---- expand 1x1: MXU matmul (bf16 operands, f32 acc) + BN + PReLU (f32) ----
    if expand:
        y = jnp.dot(x_ref[...], w_exp_ref[...],
                    preferred_element_type=jnp.float32)           # (BH, W*E) f32
        y = y * es_ref[...] + eb_ref[...]
        y = jnp.where(y > 0, y, ea_ref[...] * y)
    else:
        y = x_ref[...].astype(jnp.float32)

    # ---- MixConv depthwise: Kmax*Kmax in-register rolled taps + BN + PReLU ----
    # Lane shift (kx) and sublane shift (ky) via pltpu.roll (XLU slot, overlaps
    # with the VPU MACs).  Left/right image edges are zeroed via the per-tap
    # weight vectors (folded on the host); top/bottom edges (and cross-image
    # contamination inside the multi-image block) via the per-ky row mask.
    acc = None
    for ky in range(Kmax):
        dy = ky - pad
        if dy == 0:
            yk = y
        else:
            yk = pltpu.roll(y, shift=(-dy) % BH, axis=0) * rmask_ref[:, ky:ky + 1]
        for kx in range(Kmax):
            dx = kx - pad
            tap = ky * Kmax + kx
            ykk = yk if dx == 0 else pltpu.roll(yk, shift=(-dx * E) % WE, axis=1)
            contrib = ykk * w_dw_ref[tap:tap + 1, :]
            acc = contrib if acc is None else acc + contrib
    z = acc * ds_ref[...] + db_ref[...]
    z = jnp.where(z > 0, z, da_ref[...] * z)

    # ---- project 1x1: MXU matmul + BN (+ residual from the VMEM-resident x) ----
    out = jnp.dot(z.astype(jnp.bfloat16), w_proj_ref[...],
                  preferred_element_type=jnp.float32)             # (BH, W*Cout) f32
    out = out * ps_ref[...] + pb_ref[...]
    if residual:
        out = out + x_ref[...].astype(jnp.float32)
    o_ref[...] = out.astype(o_ref.dtype)


# ---------------------------------------------------------------------------
# One-time host-side parameter preparation (outside the jitted forward).
# ---------------------------------------------------------------------------
def prepare_mixnet_params(p, cfg, *, H, W):
    """Fold BN, build block-diagonal kron 1x1 weights and the edge-masked
    depthwise tap lane-vectors ONCE (pure numpy, no per-call XLA prep work)."""
    del H  # packing only depends on W
    E, Cin, Cout = cfg["expand_channels"], cfg["in_c"], cfg["out_c"]
    Kmax = max(cfg["kernels"])
    pad = Kmax // 2
    f32 = np.float32

    def fold_bn(bn):
        gamma, beta, mean, var = [np.asarray(t, f32) for t in bn]
        s = gamma / np.sqrt(var + BN_EPS)
        return s, beta - mean * s

    def lane_vec(v, C):                       # per-channel vec -> (1, W*C) lanes
        return jnp.asarray(np.tile(np.asarray(v, f32), W).reshape(1, W * C))

    prep = {}
    eye_w = np.eye(W, dtype=f32)

    if cfg["expand"]:
        w_pw = np.asarray(p["pw_w"], f32).reshape(E, Cin).T               # (Cin, E)
        prep["w_exp"] = jnp.asarray(np.kron(eye_w, w_pw), jnp.bfloat16)   # (W*Cin, W*E)
        s, b = fold_bn(p["pw_bn"])
        prep["exp_scale"] = lane_vec(s, E)
        prep["exp_bias"] = lane_vec(b, E)
        prep["exp_alpha"] = lane_vec(p["pw_alpha"], E)

    # unified Kmax x Kmax depthwise taps: each group's KxK taps zero-embedded
    # centered; the image left/right edge zeroing of each kx offset is folded
    # directly into the per-tap lane vector.
    w_dw = np.zeros((Kmax, Kmax, E), f32)
    off = 0
    for i, K in enumerate(cfg["kernels"]):
        Cg = cfg["splits"][i]
        o = (Kmax - K) // 2
        wk = np.transpose(np.asarray(p["dw_ws"][i], f32)[:, 0], (1, 2, 0))  # (K,K,Cg)
        w_dw[o:o + K, o:o + K, off:off + Cg] = wk
        off += Cg
    wpos = np.arange(W)
    kx_off = np.arange(Kmax) - pad
    kx_valid = ((wpos[None, :] + kx_off[:, None] >= 0) &
                (wpos[None, :] + kx_off[:, None] < W)).astype(f32)          # (Kmax, W)
    w_dw_lane = w_dw[:, :, None, :] * kx_valid[None, :, :, None]            # (Ky,Kx,W,E)
    prep["w_dw"] = jnp.asarray(w_dw_lane.reshape(Kmax * Kmax, W * E))
    s, b = fold_bn(p["dw_bn"])
    prep["dw_scale"] = lane_vec(s, E)
    prep["dw_bias"] = lane_vec(b, E)
    prep["dw_alpha"] = lane_vec(p["dw_alpha"], E)

    w_pr = np.asarray(p["proj_w"], f32).reshape(Cout, E).T                  # (E, Cout)
    prep["w_proj"] = jnp.asarray(np.kron(eye_w, w_pr), jnp.bfloat16)        # (W*E, W*Cout)
    s, b = fold_bn(p["proj_bn"])
    prep["proj_scale"] = lane_vec(s, Cout)
    prep["proj_bias"] = lane_vec(b, Cout)
    return prep


# ---------------------------------------------------------------------------
# Packed-layout forward: x_packed is (N*H, W*Cin) bf16, returns (N*H, W*Cout)
# bf16.  Chain MixNet blocks in this layout to avoid NCHW relayouts.
# ---------------------------------------------------------------------------
def mixnet_block_packed(x_packed, prep, *, cfg, H, W, imgs_per_step=4):
    NH, WCin = x_packed.shape
    N = NH // H
    Cin, Cout, E = cfg["in_c"], cfg["out_c"], cfg["expand_channels"]
    Kmax = max(cfg["kernels"])
    expand, residual = cfg["expand"], cfg["residual"]

    if residual:
        assert Cin == Cout, "residual path requires in_c == out_c"
    assert H % 8 == 0 and WCin % 128 == 0 and (W * E) % 128 == 0 \
        and (W * Cout) % 128 == 0, "lane-packed layout needs aligned H / W*C"
    assert WCin == W * Cin

    # images per grid step: bigger M for the MXU, but keep vreg pressure in the
    # 25-tap loop sane and leave several steps per core for v7x pipelining.
    B_img = 1
    for b in range(min(imgs_per_step, N), 0, -1):
        if N % b == 0:
            B_img = b
            break
    BH = B_img * H

    # per-ky row-validity mask (top/bottom image edges inside the multi-image
    # block); tiny constant built with numpy, baked into the jaxpr.
    rl = np.arange(BH) % H
    dy = np.arange(Kmax) - Kmax // 2
    rmask = jnp.asarray(((rl[:, None] + dy[None, :] >= 0) &
                         (rl[:, None] + dy[None, :] < H)).astype(np.float32))

    def full_spec(a):
        return pl.BlockSpec(a.shape, lambda n: (0, 0))

    args = [x_packed]
    in_specs = [pl.BlockSpec((BH, WCin), lambda n: (n, 0))]
    if expand:
        extra = [prep["w_exp"], prep["exp_scale"], prep["exp_bias"], prep["exp_alpha"]]
        args += extra
        in_specs += [full_spec(a) for a in extra]
    extra = [prep["w_dw"], rmask, prep["dw_scale"], prep["dw_bias"], prep["dw_alpha"]]
    args += extra
    in_specs += [full_spec(a) for a in extra]
    extra = [prep["w_proj"], prep["proj_scale"], prep["proj_bias"]]
    args += extra
    in_specs += [full_spec(a) for a in extra]

    kernel = functools.partial(
        _mixnet_fused_kernel, W=W, E=E, Kmax=Kmax, BH=BH,
        expand=expand, residual=residual)

    out = pl.pallas_call(
        kernel,
        out_shape=jax.ShapeDtypeStruct((NH, W * Cout), jnp.bfloat16),
        grid_spec=pltpu.PrefetchScalarGridSpec(
            num_scalar_prefetch=0,
            grid=(N // B_img,),
            in_specs=in_specs,
            out_specs=pl.BlockSpec((BH, W * Cout), lambda n: (n, 0)),
        ),
        compiler_params=pltpu.CompilerParams(
            dimension_semantics=("parallel",)),
    )(*args)
    return out


# Thin NCHW wrapper for the standalone test.  In a full network keep the packed
# bf16 layout across consecutive blocks instead of transposing every time.
def mixnet_block_nchw(x_nchw, prep, cfg, *, imgs_per_step=4):
    N, Cin, H, W = x_nchw.shape
    x_packed = jnp.transpose(x_nchw, (0, 2, 3, 1)).reshape(N * H, W * Cin)
    x_packed = x_packed.astype(jnp.bfloat16)
    out = mixnet_block_packed(x_packed, prep, cfg=cfg, H=H, W=W,
                              imgs_per_step=imgs_per_step)
    Cout = cfg["out_c"]
    out = out.reshape(N, H, W, Cout).astype(jnp.float32)
    return jnp.transpose(out, (0, 3, 1, 2))                       # -> NCHW f32


# ---------------------------------------------------------------------------
# Pure-JAX reference (NCHW, matches the PyTorch module in eval mode).
# bf16_like_kernel=True mirrors the kernel's bf16 touch points exactly:
# bf16 activation input/output and bf16 1x1-conv operands (f32 everywhere else).
# ---------------------------------------------------------------------------
def mixnet_block_ref(x, p, cfg, *, bf16_like_kernel=False):
    f32 = jnp.float32
    if bf16_like_kernel:
        x = x.astype(jnp.bfloat16).astype(f32)

    def bn(t, bnp):
        gamma, beta, mean, var = bnp
        s = gamma / jnp.sqrt(var + BN_EPS)
        return t * s[None, :, None, None] + (beta - mean * s)[None, :, None, None]

    def prelu(t, a):
        return jnp.where(t > 0, t, a[None, :, None, None] * t)

    def conv(t, w, groups=1, padding=0, cast=False):
        if cast:
            t = t.astype(jnp.bfloat16).astype(f32)
            w = w.astype(jnp.bfloat16).astype(f32)
        return lax.conv_general_dilated(
            t, w, (1, 1), [(padding, padding)] * 2,
            feature_group_count=groups,
            dimension_numbers=("NCHW", "OIHW", "NCHW"),
            precision=lax.Precision.HIGHEST)

    shortcut = x
    if cfg["expand"]:
        x = prelu(bn(conv(x, p["pw_w"], cast=bf16_like_kernel), p["pw_bn"]),
                  p["pw_alpha"])
    outs, off = [], 0
    for i, K in enumerate(cfg["kernels"]):
        Cg = cfg["splits"][i]
        outs.append(conv(x[:, off:off + Cg], p["dw_ws"][i], groups=Cg,
                         padding=K // 2))
        off += Cg
    x = jnp.concatenate(outs, axis=1)
    x = prelu(bn(x, p["dw_bn"]), p["dw_alpha"])
    x = bn(conv(x, p["proj_w"], cast=bf16_like_kernel), p["proj_bn"])
    if cfg["residual"]:
        x = shortcut + x
    if bf16_like_kernel:
        x = x.astype(jnp.bfloat16).astype(f32)
    return x


# ---------------------------------------------------------------------------
# Deterministic parameter initialization
# ---------------------------------------------------------------------------
def init_params(key, cfg):
    in_c, out_c, exp_c = cfg["in_c"], cfg["out_c"], cfg["expand_channels"]
    keys = list(jax.random.split(key, 32))

    def nxt():
        return keys.pop(0)

    def bn_params(c):
        return (jax.random.uniform(nxt(), (c,), minval=0.8, maxval=1.2),   # gamma
                0.1 * jax.random.normal(nxt(), (c,)),                      # beta
                0.1 * jax.random.normal(nxt(), (c,)),                      # running_mean
                jax.random.uniform(nxt(), (c,), minval=0.5, maxval=1.5))   # running_var

    p = {}
    if cfg["expand"]:
        p["pw_w"] = 0.3 * jax.random.normal(nxt(), (exp_c, in_c, 1, 1))
        p["pw_bn"] = bn_params(exp_c)
        p["pw_alpha"] = 0.25 + 0.05 * jax.random.normal(nxt(), (exp_c,))
    p["dw_ws"] = [0.3 * jax.random.normal(nxt(), (cg, 1, K, K))
                  for cg, K in zip(cfg["splits"], cfg["kernels"])]
    p["dw_bn"] = bn_params(exp_c)
    p["dw_alpha"] = 0.25 + 0.05 * jax.random.normal(nxt(), (exp_c,))
    p["proj_w"] = 0.3 * jax.random.normal(nxt(), (out_c, exp_c, 1, 1))
    p["proj_bn"] = bn_params(out_c)
    return jax.tree_util.tree_map(lambda a: a.astype(jnp.float32), p)


if __name__ == "__main__":
    # MixNetBlock(in_c=8, out_c=8, residual=True, kernel=[3, 5], stride=1,
    #             expand=2, se_reduct=1)
    in_c, out_c, expand = 8, 8, 2
    kernels = [3, 5]
    exp_c = in_c * expand
    cfg = dict(
        in_c=in_c, out_c=out_c,
        expand=(expand != 1), expand_channels=exp_c,
        kernels=kernels, splits=_split_channels(exp_c, len(kernels)),
        residual=True,
    )

    key = jax.random.PRNGKey(0)
    k_x, k_p = jax.random.split(key)
    x = jax.random.normal(k_x, (2, in_c, 16, 16), dtype=jnp.float32)
    params = init_params(k_p, cfg)

    # constant operands built once, outside the jitted forward (review item).
    prep = prepare_mixnet_params(params, cfg, H=16, W=16)

    fwd = jax.jit(functools.partial(mixnet_block_nchw, cfg=cfg))
    out = jax.block_until_ready(fwd(x, prep))

    # Tight structural check: reference with the same bf16 touch points
    # (activation I/O + 1x1 matmul operands) as the kernel.
    ref_tight = jax.block_until_ready(
        mixnet_block_ref(x, params, cfg, bf16_like_kernel=True))
    np.testing.assert_allclose(np.asarray(out), np.asarray(ref_tight),
                               rtol=1e-2, atol=1e-2)

    # Sanity check against the exact f32 reference; deviation is bounded by the
    # intentional bf16 activation I/O and bf16 MXU operand rounding.
    ref_f32 = jax.block_until_ready(mixnet_block_ref(x, params, cfg))
    np.testing.assert_allclose(np.asarray(out), np.asarray(ref_f32),
                               rtol=5e-2, atol=6e-2)
    print("KERNEL_OK")
</pallas_src>

<mosaic_0001>
module attributes {stable_mosaic.version = 11 : i64} {
  func.func @_mixnet_fused_kernel(%arg0: i32, %arg1: memref<32x128xbf16, #tpu.memory_space<vmem>>, %arg2: memref<128x256xbf16, #tpu.memory_space<vmem>>, %arg3: memref<1x256xf32, #tpu.memory_space<vmem>>, %arg4: memref<1x256xf32, #tpu.memory_space<vmem>>, %arg5: memref<1x256xf32, #tpu.memory_space<vmem>>, %arg6: memref<25x256xf32, #tpu.memory_space<vmem>>, %arg7: memref<32x5xf32, #tpu.memory_space<vmem>>, %arg8: memref<1x256xf32, #tpu.memory_space<vmem>>, %arg9: memref<1x256xf32, #tpu.memory_space<vmem>>, %arg10: memref<1x256xf32, #tpu.memory_space<vmem>>, %arg11: memref<256x128xbf16, #tpu.memory_space<vmem>>, %arg12: memref<1x128xf32, #tpu.memory_space<vmem>>, %arg13: memref<1x128xf32, #tpu.memory_space<vmem>>, %arg14: memref<32x128xbf16, #tpu.memory_space<vmem>>) attributes {dimension_semantics = [#tpu.dimension_semantics<parallel>], iteration_bounds = array<i64: 1>, scalar_prefetch = 0 : i64, scratch_operands = 0 : i64, tpu.core_type = #tpu.core_type<tc>, window_params = [{transform_indices = @transform_0, window_bounds = array<i64: 32, 128>}, {pipeline_mode = #tpu.pipeline_mode<synchronous>, transform_indices = @transform_1, window_bounds = array<i64: 128, 256>}, {pipeline_mode = #tpu.pipeline_mode<synchronous>, transform_indices = @transform_2, window_bounds = array<i64: 1, 256>}, {pipeline_mode = #tpu.pipeline_mode<synchronous>, transform_indices = @transform_3, window_bounds = array<i64: 1, 256>}, {pipeline_mode = #tpu.pipeline_mode<synchronous>, transform_indices = @transform_4, window_bounds = array<i64: 1, 256>}, {pipeline_mode = #tpu.pipeline_mode<synchronous>, transform_indices = @transform_5, window_bounds = array<i64: 25, 256>}, {pipeline_mode = #tpu.pipeline_mode<synchronous>, transform_indices = @transform_6, window_bounds = array<i64: 32, 5>}, {pipeline_mode = #tpu.pipeline_mode<synchronous>, transform_indices = @transform_7, window_bounds = array<i64: 1, 256>}, {pipeline_mode = #tpu.pipeline_mode<synchronous>, transform_indices = @transform_8, window_bounds = array<i64: 1, 256>}, {pipeline_mode = #tpu.pipeline_mode<synchronous>, transform_indices = @transform_9, window_bounds = array<i64: 1, 256>}, {pipeline_mode = #tpu.pipeline_mode<synchronous>, transform_indices = @transform_10, window_bounds = array<i64: 256, 128>}, {pipeline_mode = #tpu.pipeline_mode<synchronous>, transform_indices = @transform_11, window_bounds = array<i64: 1, 128>}, {pipeline_mode = #tpu.pipeline_mode<synchronous>, transform_indices = @transform_12, window_bounds = array<i64: 1, 128>}, {transform_indices = @transform_13, window_bounds = array<i64: 32, 128>}]} {
    %c0 = arith.constant 0 : index
    %c0_0 = arith.constant 0 : index
    %0 = vector.load %arg1[%c0, %c0_0] : memref<32x128xbf16, #tpu.memory_space<vmem>>, vector<32x128xbf16>
    %c0_1 = arith.constant 0 : index
    %c0_2 = arith.constant 0 : index
    %1 = vector.load %arg2[%c0_1, %c0_2] : memref<128x256xbf16, #tpu.memory_space<vmem>>, vector<128x256xbf16>
    %cst = arith.constant dense<0.000000e+00> : vector<32x256xf32>
    %2 = tpu.matmul %0, %1, %cst {dimension_numbers = #tpu.dot_dimension_numbers<[1], [0], [0], [1], [0, 0, 1, 1], [], []>} : vector<32x128xbf16>, vector<128x256xbf16>, vector<32x256xf32> -> vector<32x256xf32>
    %c0_3 = arith.constant 0 : index
    %c0_4 = arith.constant 0 : index
    %3 = vector.load %arg3[%c0_3, %c0_4] : memref<1x256xf32, #tpu.memory_space<vmem>>, vector<1x256xf32>
    %4 = vector.broadcast %3 : vector<1x256xf32> to vector<32x256xf32>
    %5 = arith.mulf %2, %4 : vector<32x256xf32>
    %c0_5 = arith.constant 0 : index
    %c0_6 = arith.constant 0 : index
    %6 = vector.load %arg4[%c0_5, %c0_6] : memref<1x256xf32, #tpu.memory_space<vmem>>, vector<1x256xf32>
    %7 = vector.broadcast %6 : vector<1x256xf32> to vector<32x256xf32>
    %8 = arith.addf %5, %7 : vector<32x256xf32>
    %cst_7 = arith.constant 0.000000e+00 : f32
    %9 = vector.broadcast %cst_7 : f32 to vector<32x256xf32>
    %10 = arith.cmpf ogt, %8, %9 : vector<32x256xf32>
    %c0_8 = arith.constant 0 : index
    %c0_9 = arith.constant 0 : index
    %11 = vector.load %arg5[%c0_8, %c0_9] : memref<1x256xf32, #tpu.memory_space<vmem>>, vector<1x256xf32>
    %12 = vector.broadcast %11 : vector<1x256xf32> to vector<32x256xf32>
    %13 = arith.mulf %12, %8 : vector<32x256xf32>
    %14 = arith.select %10, %8, %13 : vector<32x256xi1>, vector<32x256xf32>
    %c2_i32 = arith.constant 2 : i32
    %15 = tpu.dynamic_rotate %14 by %c2_i32 dim 0 : vector<32x256xf32>, i32 -> vector<32x256xf32>
    %c0_10 = arith.constant 0 : index
    %c0_11 = arith.constant 0 : index
    %16 = vector.load %arg7[%c0_10, %c0_11] : memref<32x5xf32, #tpu.memory_space<vmem>>, vector<32x1xf32>
    %17 = vector.broadcast %16 : vector<32x1xf32> to vector<32x256xf32>
    %18 = arith.mulf %15, %17 : vector<32x256xf32>
    %c32_i32 = arith.constant 32 : i32
    %19 = tpu.dynamic_rotate %18 by %c32_i32 dim 1 : vector<32x256xf32>, i32 -> vector<32x256xf32>
    %c0_12 = arith.constant 0 : index
    %c0_13 = arith.constant 0 : index
    %20 = vector.load %arg6[%c0_12, %c0_13] : memref<25x256xf32, #tpu.memory_space<vmem>>, vector<1x256xf32>
    %21 = vector.broadcast %20 : vector<1x256xf32> to vector<32x256xf32>
    %22 = arith.mulf %19, %21 : vector<32x256xf32>
    %c16_i32 = arith.constant 16 : i32
    %23 = tpu.dynamic_rotate %18 by %c16_i32 dim 1 : vector<32x256xf32>, i32 -> vector<32x256xf32>
    %c1 = arith.constant 1 : index
    %c0_14 = arith.constant 0 : index
    %24 = vector.load %arg6[%c1, %c0_14] : memref<25x256xf32, #tpu.memory_space<vmem>>, vector<1x256xf32>
    %25 = vector.broadcast %24 : vector<1x256xf32> to vector<32x256xf32>
    %26 = arith.mulf %23, %25 : vector<32x256xf32>
    %27 = arith.addf %22, %26 : vector<32x256xf32>
    %c2 = arith.constant 2 : index
    %c0_15 = arith.constant 0 : index
    %28 = vector.load %arg6[%c2, %c0_15] : memref<25x256xf32, #tpu.memory_space<vmem>>, vector<1x256xf32>
    %29 = vector.broadcast %28 : vector<1x256xf32> to vector<32x256xf32>
    %30 = arith.mulf %18, %29 : vector<32x256xf32>
    %31 = arith.addf %27, %30 : vector<32x256xf32>
    %c240_i32 = arith.constant 240 : i32
    %32 = tpu.dynamic_rotate %18 by %c240_i32 dim 1 : vector<32x256xf32>, i32 -> vector<32x256xf32>
    %c3 = arith.constant 3 : index
    %c0_16 = arith.constant 0 : index
    %33 = vector.load %arg6[%c3, %c0_16] : memref<25x256xf32, #tpu.memory_space<vmem>>, vector<1x256xf32>
    %34 = vector.broadcast %33 : vector<1x256xf32> to vector<32x256xf32>
    %35 = arith.mulf %32, %34 : vector<32x256xf32>
    %36 = arith.addf %31, %35 : vector<32x256xf32>
    %c224_i32 = arith.constant 224 : i32
    %37 = tpu.dynamic_rotate %18 by %c224_i32 dim 1 : vector<32x256xf32>, i32 -> vector<32x256xf32>
    %c4 = arith.constant 4 : index
    %c0_17 = arith.constant 0 : index
    %38 = vector.load %arg6[%c4, %c0_17] : memref<25x256xf32, #tpu.memory_space<vmem>>, vector<1x256xf32>
    %39 = vector.broadcast %38 : vector<1x256xf32> to vector<32x256xf32>
    %40 = arith.mulf %37, %39 : vector<32x256xf32>
    %41 = arith.addf %36, %40 : vector<32x256xf32>
    %c1_i32 = arith.constant 1 : i32
    %42 = tpu.dynamic_rotate %14 by %c1_i32 dim 0 : vector<32x256xf32>, i32 -> vector<32x256xf32>
    %c0_18 = arith.constant 0 : index
    %c1_19 = arith.constant 1 : index
    %43 = vector.load %arg7[%c0_18, %c1_19] : memref<32x5xf32, #tpu.memory_space<vmem>>, vector<32x1xf32>
    %44 = vector.broadcast %43 : vector<32x1xf32> to vector<32x256xf32>
    %45 = arith.mulf %42, %44 : vector<32x256xf32>
    %c32_i32_20 = arith.constant 32 : i32
    %46 = tpu.dynamic_rotate %45 by %c32_i32_20 dim 1 : vector<32x256xf32>, i32 -> vector<32x256xf32>
    %c5 = arith.constant 5 : index
    %c0_21 = arith.constant 0 : index
    %47 = vector.load %arg6[%c5, %c0_21] : memref<25x256xf32, #tpu.memory_space<vmem>>, vector<1x256xf32>
    %48 = vector.broadcast %47 : vector<1x256xf32> to vector<32x256xf32>
    %49 = arith.mulf %46, %48 : vector<32x256xf32>
    %50 = arith.addf %41, %49 : vector<32x256xf32>
    %c16_i32_22 = arith.constant 16 : i32
    %51 = tpu.dynamic_rotate %45 by %c16_i32_22 dim 1 : vector<32x256xf32>, i32 -> vector<32x256xf32>
    %c6 = arith.constant 6 : index
    %c0_23 = arith.constant 0 : index
    %52 = vector.load %arg6[%c6, %c0_23] : memref<25x256xf32, #tpu.memory_space<vmem>>, vector<1x256xf32>
    %53 = vector.broadcast %52 : vector<1x256xf32> to vector<32x256xf32>
    %54 = arith.mulf %51, %53 : vector<32x256xf32>
    %55 = arith.addf %50, %54 : vector<32x256xf32>
    %c7 = arith.constant 7 : index
    %c0_24 = arith.constant 0 : index
    %56 = vector.load %arg6[%c7, %c0_24] : memref<25x256xf32, #tpu.memory_space<vmem>>, vector<1x256xf32>
    %57 = vector.broadcast %56 : vector<1x256xf32> to vector<32x256xf32>
    %58 = arith.mulf %45, %57 : vector<32x256xf32>
    %59 = arith.addf %55, %58 : vector<32x256xf32>
    %c240_i32_25 = arith.constant 240 : i32
    %60 = tpu.dynamic_rotate %45 by %c240_i32_25 dim 1 : vector<32x256xf32>, i32 -> vector<32x256xf32>
    %c8 = arith.constant 8 : index
    %c0_26 = arith.constant 0 : index
    %61 = vector.load %arg6[%c8, %c0_26] : memref<25x256xf32, #tpu.memory_space<vmem>>, vector<1x256xf32>
    %62 = vector.broadcast %61 : vector<1x256xf32> to vector<32x256xf32>
    %63 = arith.mulf %60, %62 : vector<32x256xf32>
    %64 = arith.addf %59, %63 : vector<32x256xf32>
    %c224_i32_27 = arith.constant 224 : i32
    %65 = tpu.dynamic_rotate %45 by %c224_i32_27 dim 1 : vector<32x256xf32>, i32 -> vector<32x256xf32>
    %c9 = arith.constant 9 : index
    %c0_28 = arith.constant 0 : index
    %66 = vector.load %arg6[%c9, %c0_28] : memref<25x256xf32, #tpu.memory_space<vmem>>, vector<1x256xf32>
    %67 = vector.broadcast %66 : vector<1x256xf32> to vector<32x256xf32>
    %68 = arith.mulf %65, %67 : vector<32x256xf32>
    %69 = arith.addf %64, %68 : vector<32x256xf32>
    %c32_i32_29 = arith.constant 32 : i32
    %70 = tpu.dynamic_rotate %14 by %c32_i32_29 dim 1 : vector<32x256xf32>, i32 -> vector<32x256xf32>
    %c10 = arith.constant 10 : index
    %c0_30 = arith.constant 0 : index
    %71 = vector.load %arg6[%c10, %c0_30] : memref<25x256xf32, #tpu.memory_space<vmem>>, vector<1x256xf32>
    %72 = vector.broadcast %71 : vector<1x256xf32> to vector<32x256xf32>
    %73 = arith.mulf %70, %72 : vector<32x256xf32>
    %74 = arith.addf %69, %73 : vector<32x256xf32>
    %c16_i32_31 = arith.constant 16 : i32
    %75 = tpu.dynamic_rotate %14 by %c16_i32_31 dim 1 : vector<32x256xf32>, i32 -> vector<32x256xf32>
    %c11 = arith.constant 11 : index
    %c0_32 = arith.constant 0 : index
    %76 = vector.load %arg6[%c11, %c0_32] : memref<25x256xf32, #tpu.memory_space<vmem>>, vector<1x256xf32>
    %77 = vector.broadcast %76 : vector<1x256xf32> to vector<32x256xf32>
    %78 = arith.mulf %75, %77 : vector<32x256xf32>
    %79 = arith.addf %74, %78 : vector<32x256xf32>
    %c12 = arith.constant 12 : index
    %c0_33 = arith.constant 0 : index
    %80 = vector.load %arg6[%c12, %c0_33] : memref<25x256xf32, #tpu.memory_space<vmem>>, vector<1x256xf32>
    %81 = vector.broadcast %80 : vector<1x256xf32> to vector<32x256xf32>
    %82 = arith.mulf %14, %81 : vector<32x256xf32>
    %83 = arith.addf %79, %82 : vector<32x256xf32>
    %c240_i32_34 = arith.constant 240 : i32
    %84 = tpu.dynamic_rotate %14 by %c240_i32_34 dim 1 : vector<32x256xf32>, i32 -> vector<32x256xf32>
    %c13 = arith.constant 13 : index
    %c0_35 = arith.constant 0 : index
    %85 = vector.load %arg6[%c13, %c0_35] : memref<25x256xf32, #tpu.memory_space<vmem>>, vector<1x256xf32>
    %86 = vector.broadcast %85 : vector<1x256xf32> to vector<32x256xf32>
    %87 = arith.mulf %84, %86 : vector<32x256xf32>
    %88 = arith.addf %83, %87 : vector<32x256xf32>
    %c224_i32_36 = arith.constant 224 : i32
    %89 = tpu.dynamic_rotate %14 by %c224_i32_36 dim 1 : vector<32x256xf32>, i32 -> vector<32x256xf32>
    %c14 = arith.constant 14 : index
    %c0_37 = arith.constant 0 : index
    %90 = vector.load %arg6[%c14, %c0_37] : memref<25x256xf32, #tpu.memory_space<vmem>>, vector<1x256xf32>
    %91 = vector.broadcast %90 : vector<1x256xf32> to vector<32x256xf32>
    %92 = arith.mulf %89, %91 : vector<32x256xf32>
    %93 = arith.addf %88, %92 : vector<32x256xf32>
    %c31_i32 = arith.constant 31 : i32
    %94 = tpu.dynamic_rotate %14 by %c31_i32 dim 0 : vector<32x256xf32>, i32 -> vector<32x256xf32>
    %c0_38 = arith.constant 0 : index
    %c3_39 = arith.constant 3 : index
    %95 = vector.load %arg7[%c0_38, %c3_39] : memref<32x5xf32, #tpu.memory_space<vmem>>, vector<32x1xf32>
    %96 = vector.broadcast %95 : vector<32x1xf32> to vector<32x256xf32>
    %97 = arith.mulf %94, %96 : vector<32x256xf32>
    %c32_i32_40 = arith.constant 32 : i32
    %98 = tpu.dynamic_rotate %97 by %c32_i32_40 dim 1 : vector<32x256xf32>, i32 -> vector<32x256xf32>
    %c15 = arith.constant 15 : index
    %c0_41 = arith.constant 0 : index
    %99 = vector.load %arg6[%c15, %c0_41] : memref<25x256xf32, #tpu.memory_space<vmem>>, vector<1x256xf32>
    %100 = vector.broadcast %99 : vector<1x256xf32> to vector<32x256xf32>
    %101 = arith.mulf %98, %100 : vector<32x256xf32>
    %102 = arith.addf %93, %101 : vector<32x256xf32>
    %c16_i32_42 = arith.constant 16 : i32
    %103 = tpu.dynamic_rotate %97 by %c16_i32_42 dim 1 : vector<32x256xf32>, i32 -> vector<32x256xf32>
    %c16 = arith.constant 16 : index
    %c0_43 = arith.constant 0 : index
    %104 = vector.load %arg6[%c16, %c0_43] : memref<25x256xf32, #tpu.memory_space<vmem>>, vector<1x256xf32>
    %105 = vector.broadcast %104 : vector<1x256xf32> to vector<32x256xf32>
    %106 = arith.mulf %103, %105 : vector<32x256xf32>
    %107 = arith.addf %102, %106 : vector<32x256xf32>
    %c17 = arith.constant 17 : index
    %c0_44 = arith.constant 0 : index
    %108 = vector.load %arg6[%c17, %c0_44] : memref<25x256xf32, #tpu.memory_space<vmem>>, vector<1x256xf32>
    %109 = vector.broadcast %108 : vector<1x256xf32> to vector<32x256xf32>
    %110 = arith.mulf %97, %109 : vector<32x256xf32>
    %111 = arith.addf %107, %110 : vector<32x256xf32>
    %c240_i32_45 = arith.constant 240 : i32
    %112 = tpu.dynamic_rotate %97 by %c240_i32_45 dim 1 : vector<32x256xf32>, i32 -> vector<32x256xf32>
    %c18 = arith.constant 18 : index
    %c0_46 = arith.constant 0 : index
    %113 = vector.load %arg6[%c18, %c0_46] : memref<25x256xf32, #tpu.memory_space<vmem>>, vector<1x256xf32>
    %114 = vector.broadcast %113 : vector<1x256xf32> to vector<32x256xf32>
    %115 = arith.mulf %112, %114 : vector<32x256xf32>
    %116 = arith.addf %111, %115 : vector<32x256xf32>
    %c224_i32_47 = arith.constant 224 : i32
    %117 = tpu.dynamic_rotate %97 by %c224_i32_47 dim 1 : vector<32x256xf32>, i32 -> vector<32x256xf32>
    %c19 = arith.constant 19 : index
    %c0_48 = arith.constant 0 : index
    %118 = vector.load %arg6[%c19, %c0_48] : memref<25x256xf32, #tpu.memory_space<vmem>>, vector<1x256xf32>
    %119 = vector.broadcast %118 : vector<1x256xf32> to vector<32x256xf32>
    %120 = arith.mulf %117, %119 : vector<32x256xf32>
    %121 = arith.addf %116, %120 : vector<32x256xf32>
    %c30_i32 = arith.constant 30 : i32
    %122 = tpu.dynamic_rotate %14 by %c30_i32 dim 0 : vector<32x256xf32>, i32 -> vector<32x256xf32>
    %c0_49 = arith.constant 0 : index
    %c4_50 = arith.constant 4 : index
    %123 = vector.load %arg7[%c0_49, %c4_50] : memref<32x5xf32, #tpu.memory_space<vmem>>, vector<32x1xf32>
    %124 = vector.broadcast %123 : vector<32x1xf32> to vector<32x256xf32>
    %125 = arith.mulf %122, %124 : vector<32x256xf32>
    %c32_i32_51 = arith.constant 32 : i32
    %126 = tpu.dynamic_rotate %125 by %c32_i32_51 dim 1 : vector<32x256xf32>, i32 -> vector<32x256xf32>
    %c20 = arith.constant 20 : index
    %c0_52 = arith.constant 0 : index
    %127 = vector.load %arg6[%c20, %c0_52] : memref<25x256xf32, #tpu.memory_space<vmem>>, vector<1x256xf32>
    %128 = vector.broadcast %127 : vector<1x256xf32> to vector<32x256xf32>
    %129 = arith.mulf %126, %128 : vector<32x256xf32>
    %130 = arith.addf %121, %129 : vector<32x256xf32>
    %c16_i32_53 = arith.constant 16 : i32
    %131 = tpu.dynamic_rotate %125 by %c16_i32_53 dim 1 : vector<32x256xf32>, i32 -> vector<32x256xf32>
    %c21 = arith.constant 21 : index
    %c0_54 = arith.constant 0 : index
    %132 = vector.load %arg6[%c21, %c0_54] : memref<25x256xf32, #tpu.memory_space<vmem>>, vector<1x256xf32>
    %133 = vector.broadcast %132 : vector<1x256xf32> to vector<32x256xf32>
    %134 = arith.mulf %131, %133 : vector<32x256xf32>
    %135 = arith.addf %130, %134 : vector<32x256xf32>
    %c22 = arith.constant 22 : index
    %c0_55 = arith.constant 0 : index
    %136 = vector.load %arg6[%c22, %c0_55] : memref<25x256xf32, #tpu.memory_space<vmem>>, vector<1x256xf32>
    %137 = vector.broadcast %136 : vector<1x256xf32> to vector<32x256xf32>
    %138 = arith.mulf %125, %137 : vector<32x256xf32>
    %139 = arith.addf %135, %138 : vector<32x256xf32>
    %c240_i32_56 = arith.constant 240 : i32
    %140 = tpu.dynamic_rotate %125 by %c240_i32_56 dim 1 : vector<32x256xf32>, i32 -> vector<32x256xf32>
    %c23 = arith.constant 23 : index
    %c0_57 = arith.constant 0 : index
    %141 = vector.load %arg6[%c23, %c0_57] : memref<25x256xf32, #tpu.memory_space<vmem>>, vector<1x256xf32>
    %142 = vector.broadcast %141 : vector<1x256xf32> to vector<32x256xf32>
    %143 = arith.mulf %140, %142 : vector<32x256xf32>
    %144 = arith.addf %139, %143 : vector<32x256xf32>
    %c224_i32_58 = arith.constant 224 : i32
    %145 = tpu.dynamic_rotate %125 by %c224_i32_58 dim 1 : vector<32x256xf32>, i32 -> vector<32x256xf32>
    %c24 = arith.constant 24 : index
    %c0_59 = arith.constant 0 : index
    %146 = vector.load %arg6[%c24, %c0_59] : memref<25x256xf32, #tpu.memory_space<vmem>>, vector<1x256xf32>
    %147 = vector.broadcast %146 : vector<1x256xf32> to vector<32x256xf32>
    %148 = arith.mulf %145, %147 : vector<32x256xf32>
    %149 = arith.addf %144, %148 : vector<32x256xf32>
    %c0_60 = arith.constant 0 : index
    %c0_61 = arith.constant 0 : index
    %150 = vector.load %arg8[%c0_60, %c0_61] : memref<1x256xf32, #tpu.memory_space<vmem>>, vector<1x256xf32>
    %151 = vector.broadcast %150 : vector<1x256xf32> to vector<32x256xf32>
    %152 = arith.mulf %149, %151 : vector<32x256xf32>
    %c0_62 = arith.constant 0 : index
    %c0_63 = arith.constant 0 : index
    %153 = vector.load %arg9[%c0_62, %c0_63] : memref<1x256xf32, #tpu.memory_space<vmem>>, vector<1x256xf32>
    %154 = vector.broadcast %153 : vector<1x256xf32> to vector<32x256xf32>
    %155 = arith.addf %152, %154 : vector<32x256xf32>
    %cst_64 = arith.constant 0.000000e+00 : f32
    %156 = vector.broadcast %cst_64 : f32 to vector<32x256xf32>
    %157 = arith.cmpf ogt, %155, %156 : vector<32x256xf32>
    %c0_65 = arith.constant 0 : index
    %c0_66 = arith.constant 0 : index
    %158 = vector.load %arg10[%c0_65, %c0_66] : memref<1x256xf32, #tpu.memory_space<vmem>>, vector<1x256xf32>
    %159 = vector.broadcast %158 : vector<1x256xf32> to vector<32x256xf32>
    %160 = arith.mulf %159, %155 : vector<32x256xf32>
    %161 = arith.select %157, %155, %160 : vector<32x256xi1>, vector<32x256xf32>
    %162 = arith.truncf %161 : vector<32x256xf32> to vector<32x256xbf16>
    %c0_67 = arith.constant 0 : index
    %c0_68 = arith.constant 0 : index
    %163 = vector.load %arg11[%c0_67, %c0_68] : memref<256x128xbf16, #tpu.memory_space<vmem>>, vector<256x128xbf16>
    %cst_69 = arith.constant dense<0.000000e+00> : vector<32x128xf32>
    %164 = tpu.matmul %162, %163, %cst_69 {dimension_numbers = #tpu.dot_dimension_numbers<[1], [0], [0], [1], [0, 0, 1, 1], [], []>} : vector<32x256xbf16>, vector<256x128xbf16>, vector<32x128xf32> -> vector<32x128xf32>
    %c0_70 = arith.constant 0 : index
    %c0_71 = arith.constant 0 : index
    %165 = vector.load %arg12[%c0_70, %c0_71] : memref<1x128xf32, #tpu.memory_space<vmem>>, vector<1x128xf32>
    %166 = vector.broadcast %165 : vector<1x128xf32> to vector<32x128xf32>
    %167 = arith.mulf %164, %166 : vector<32x128xf32>
    %c0_72 = arith.constant 0 : index
    %c0_73 = arith.constant 0 : index
    %168 = vector.load %arg13[%c0_72, %c0_73] : memref<1x128xf32, #tpu.memory_space<vmem>>, vector<1x128xf32>
    %169 = vector.broadcast %168 : vector<1x128xf32> to vector<32x128xf32>
    %170 = arith.addf %167, %169 : vector<32x128xf32>
    %c0_74 = arith.constant 0 : index
    %c0_75 = arith.constant 0 : index
    %171 = vector.load %arg1[%c0_74, %c0_75] : memref<32x128xbf16, #tpu.memory_space<vmem>>, vector<32x128xbf16>
    %172 = arith.extf %171 : vector<32x128xbf16> to vector<32x128xf32>
    %173 = arith.addf %170, %172 : vector<32x128xf32>
    %174 = arith.truncf %173 : vector<32x128xf32> to vector<32x128xbf16>
    %c0_76 = arith.constant 0 : index
    %c0_77 = arith.constant 0 : index
    %175 = vector.load %arg14[%c0_76, %c0_77] : memref<32x128xbf16, #tpu.memory_space<vmem>>, vector<32x128xbf16>
    tpu.vector_store %arg14[%c0_76, %c0_77], %174 {strides = array<i32>} : memref<32x128xbf16, #tpu.memory_space<vmem>>, vector<32x128xbf16>,
    return
  }
  func.func @transform_0(%arg0: i32) -> (i32, i32) {
    %c0_i32 = arith.constant 0 : i32
    %c0_i32_0 = arith.constant 0 : i32
    return %arg0, %c0_i32 : i32, i32
  }
  func.func @transform_1(%arg0: i32) -> (i32, i32) {
    %c0_i32 = arith.constant 0 : i32
    %c0_i32_0 = arith.constant 0 : i32
    %c0_i32_1 = arith.constant 0 : i32
    return %c0_i32, %c0_i32_0 : i32, i32
  }
  func.func @transform_2(%arg0: i32) -> (i32, i32) {
    %c0_i32 = arith.constant 0 : i32
    %c0_i32_0 = arith.constant 0 : i32
    %c0_i32_1 = arith.constant 0 : i32
    return %c0_i32, %c0_i32_0 : i32, i32
  }
  func.func @transform_3(%arg0: i32) -> (i32, i32) {
    %c0_i32 = arith.constant 0 : i32
    %c0_i32_0 = arith.constant 0 : i32
    %c0_i32_1 = arith.constant 0 : i32
    return %c0_i32, %c0_i32_0 : i32, i32
  }
  func.func @transform_4(%arg0: i32) -> (i32, i32) {
    %c0_i32 = arith.constant 0 : i32
    %c0_i32_0 = arith.constant 0 : i32
    %c0_i32_1 = arith.constant 0 : i32
    return %c0_i32, %c0_i32_0 : i32, i32
  }
  func.func @transform_5(%arg0: i32) -> (i32, i32) {
    %c0_i32 = arith.constant 0 : i32
    %c0_i32_0 = arith.constant 0 : i32
    %c0_i32_1 = arith.constant 0 : i32
    return %c0_i32, %c0_i32_0 : i32, i32
  }
  func.func @transform_6(%arg0: i32) -> (i32, i32) {
    %c0_i32 = arith.constant 0 : i32
    %c0_i32_0 = arith.constant 0 : i32
    %c0_i32_1 = arith.constant 0 : i32
    return %c0_i32, %c0_i32_0 : i32, i32
  }
  func.func @transform_7(%arg0: i32) -> (i32, i32) {
    %c0_i32 = arith.constant 0 : i32
    %c0_i32_0 = arith.constant 0 : i32
    %c0_i32_1 = arith.constant 0 : i32
    return %c0_i32, %c0_i32_0 : i32, i32
  }
  func.func @transform_8(%arg0: i32) -> (i32, i32) {
    %c0_i32 = arith.constant 0 : i32
    %c0_i32_0 = arith.constant 0 : i32
    %c0_i32_1 = arith.constant 0 : i32
    return %c0_i32, %c0_i32_0 : i32, i32
  }
  func.func @transform_9(%arg0: i32) -> (i32, i32) {
    %c0_i32 = arith.constant 0 : i32
    %c0_i32_0 = arith.constant 0 : i32
    %c0_i32_1 = arith.constant 0 : i32
    return %c0_i32, %c0_i32_0 : i32, i32
  }
  func.func @transform_10(%arg0: i32) -> (i32, i32) {
    %c0_i32 = arith.constant 0 : i32
    %c0_i32_0 = arith.constant 0 : i32
    %c0_i32_1 = arith.constant 0 : i32
    return %c0_i32, %c0_i32_0 : i32, i32
  }
  func.func @transform_11(%arg0: i32) -> (i32, i32) {
    %c0_i32 = arith.constant 0 : i32
    %c0_i32_0 = arith.constant 0 : i32
    %c0_i32_1 = arith.constant 0 : i32
    return %c0_i32, %c0_i32_0 : i32, i32
  }
  func.func @transform_12(%arg0: i32) -> (i32, i32) {
    %c0_i32 = arith.constant 0 : i32
    %c0_i32_0 = arith.constant 0 : i32
    %c0_i32_1 = arith.constant 0 : i32
    return %c0_i32, %c0_i32_0 : i32, i32
  }
  func.func @transform_13(%arg0: i32) -> (i32, i32) {
    %c0_i32 = arith.constant 0 : i32
    %c0_i32_0 = arith.constant 0 : i32
    return %arg0, %c0_i32 : i32, i32
  }
}

</mosaic_0001>

<bundles_post_ra>
// kernel: mixnet_block_nchw.1
= control target key start
LH: loop header
LB: loop body
LE: loop exit
PB: predicated region body
PF: predicated region fallthrough
CT: control target
= control target key end

     0   :  { %v2142_v1 = vmov 0   ;;  %v2143_v18 = vmov 1   ;;  %v2144_v23 = vmov 3   ;;  %v2145_v25 = vmov 4   ;;  %s2149_s22 = smov 96   ;;  %s4389_s1 = inlined_call_operand.vmem [shape: bf16[128,256], index: 1, kind: input, shape index: {}]   ;;  %s4390_s6 = inlined_call_operand.vmem [shape: f32[32,5], index: 6, kind: input, shape index: {}]   ;;  %s4391_s0 = inlined_call_operand.vmem [shape: bf16[32,128], index: 0, kind: input, shape index: {}]   ;;  %s4392_s2 = inlined_call_operand.vmem [shape: f32[1,256], index: 2, kind: input, shape index: {}]   ;;  %s4393_s3 = inlined_call_operand.vmem [shape: f32[1,256], index: 3, kind: input, shape index: {}]   ;;  %s4394_s4 = inlined_call_operand.vmem [shape: f32[1,256], index: 4, kind: input, shape index: {}]   ;;  %s4395_s5 = inlined_call_operand.vmem [shape: f32[25,256], index: 5, kind: input, shape index: {}]   ;;  %s4396_s10 = inlined_call_operand.vmem [shape: bf16[256,128], index: 10, kind: input, shape index: {}]   ;;  %s4397_s7 = inlined_call_operand.vmem [shape: f32[1,256], index: 7, kind: input, shape index: {}]   ;;  %s4398_s8 = inlined_call_operand.vmem [shape: f32[1,256], index: 8, kind: input, shape index: {}]   ;;  %s4399_s9 = inlined_call_operand.vmem [shape: f32[1,256], index: 9, kind: input, shape index: {}]   ;;  %s4400_s11 = inlined_call_operand.vmem [shape: f32[1,128], index: 11, kind: input, shape index: {}]   ;;  %s4401_s12 = inlined_call_operand.vmem [shape: f32[1,128], index: 12, kind: input, shape index: {}]   ;;  %s4402_s13 = inlined_call_operand.vmem [shape: bf16[32,128], index: 13, kind: output, shape index: {}]  }
   0x1   :  { %v2096_v0 = vld [vmem:[%s4389_s1 + $0x74] ss:$8 sps:$4 sm:$0xff]   ;;  %189 = vmatprep.mubr.bf16.mxu0 %v2142_v1  ;;  %2089 = vset.pattern.permute.xlu1 %v2142_v1  ;;  %v2098_v2 = vld [vmem:[%s4389_s1 + $0x70] ss:$8 sps:$4 sm:$0xff]   ;;  %v2099_v3 = vld [vmem:[%s4389_s1 + $0x64] ss:$8 sps:$4 sm:$0xff]   ;;  %v4403_v26 = vlaneseq }
   0x2   :  { %2088 = vset.pattern.permute.xlu0 %v2142_v1  ;;  %157 = vmatprep.subr.bf16.mxu0 %v2096_v0  ;;  %v2101_v4 = vld [vmem:[%s4389_s1 + $0x60] ss:$8 sps:$4 sm:$0xff]   ;;  %v2102_v5 = vld [vmem:[%s4389_s1 + $0x54] ss:$8 sps:$4 sm:$0xff]   ;;  %v2104_v6 = vld [vmem:[%s4389_s1 + $0x50] ss:$8 sps:$4 sm:$0xff]  }
   0x3   :  { %158 = vmatpush1.bf16.msra.mxu0 %v2098_v2  ;;  %v2105_v7 = vld [vmem:[%s4389_s1 + $0x44] ss:$8 sps:$4 sm:$0xff]   ;;  %v2107_v8 = vld [vmem:[%s4389_s1 + $0x40] ss:$8 sps:$4 sm:$0xff]   ;;  %v307_v9 = vld [vmem:[%s4390_s6 + $0x10] sm:$0xff]  ;;  %v2287_v27 = vshrl.u32 %v4403_v26, 7 }
   0x4   :  { %159 = vmatprep.subr.bf16.mxu0 %v2099_v3  ;;  %v2108_v10 = vld [vmem:[%s4389_s1 + $0x34] ss:$8 sps:$4 sm:$0xff]   ;;  %321 = vperm.xlu1 %2089, %v307_v9   ;;  %v305_v11 = vld [vmem:[%s4390_s6] sm:$0xff]  ;;  %v306_v13 = vld [vmem:[%s4390_s6 + $0x8] sm:$0xff] }
   0x5   :  { %v308_v12 = vld [vmem:[%s4390_s6 + $0x18] sm:$0xff]  ;;  %311 = vperm.xlu0 %2088, %v305_v11   ;;  %v2111_v15 = vld [vmem:[%s4389_s1 + $0x24] ss:$8 sps:$4 sm:$0xff]   ;;  %v2113_v16 = vld [vmem:[%s4389_s1 + $0x20] ss:$8 sps:$4 sm:$0xff]   ;;  %v2290_v28 = vsub.s32 0, %v2287_v27 }
   0x6   :  { %v2110_v14 = vld [vmem:[%s4389_s1 + $0x30] ss:$8 sps:$4 sm:$0xff]   ;;  %v2114_v17 = vld [vmem:[%s4389_s1 + $0x14] ss:$8 sps:$4 sm:$0xff]   ;;  %v2117_v20 = vld [vmem:[%s4389_s1 + $0x4] ss:$8 sps:$4 sm:$0xff]  }
   0x7   :  { %160 = vmatpush1.bf16.msra.mxu0 %v2101_v4  ;;  %v2116_v19 = vld [vmem:[%s4389_s1 + $0x10] ss:$8 sps:$4 sm:$0xff]   ;;  %v2119_v21 = vld [vmem:[%s4389_s1] ss:$8 sps:$4 sm:$0xff]   ;;  %4529 = vst [vmem:[#allocation2_spill] sm:$0xff] %v2290_v28  ;;  %v2296_v30 = vsub.s32 1, %v2287_v27 }
   0x8   :  { %161 = vmatprep.subr.bf16.mxu0 %v2102_v5  ;;  %326 = vperm.xlu1 %2089, %v308_v12   ;;  %v45_v22 = vld [vmem:[%s4391_s0] sm:$0xff]   ;;  %v47_v24 = vld [vmem:[%s4391_s0 + $0x8] sm:$0xff]   ;;  %vm1388_vm3 = vcmp.lt.s32.totalorder %v2287_v27, 6  ;;  %vm1106_vm7 = vcmp.lt.s32.totalorder %v2287_v27, 7  ;;  %vm296_vm10 = vcmp.lt.s32.totalorder %v2287_v27, 2  ;;  %vm583_vm11 = vcmp.lt.s32.totalorder %v2287_v27, 1 }
   0x9   :  { %316 = vperm.xlu0 %2088, %v306_v13   ;;  %v210_v29 = vld [vmem:[%s4392_s2] sm:$0x3]  ;;  %4530 = vst [vmem:[#allocation3_spill] sm:$0xff] %v2296_v30  ;;  %s2146_s2 = smov 32  }
   0xa   :  { %v230_v31 = vld [vmem:[%s4393_s3] sm:$0x3]  ;;  %v215_v32 = vrot.slane %v210_v29, %v2290_v28  ;;  %v219_v35 = vrot.slane %v210_v29, %v2296_v30  ;;  %s2147_s3 = smov 16  }
   0xb   :  { %162 = vmatpush1.bf16.msra.mxu0 %v2104_v6  ;;  %v258_v33 = vld [vmem:[%s4394_s4] sm:$0x3]  ;;  %v235_v34 = vrot.slane %v230_v31, %v2290_v28  ;;  %v2309_v39 = vrot.slane %v230_v31, %v2296_v30  ;;  %s2148_s4 = smov 112  }
   0xc   :  { %163 = vmatprep.subr.bf16.mxu0 %v2105_v7  ;;  %2091 = vset.pattern.permute.xlu1 %v2143_v18  ;;  %v263_v38 = vrot.slane %v258_v33, %v2290_v28  ;;  %v2312_v43 = vrot.slane %v258_v33, %v2296_v30 }
   0xd   :  { %597 = vperm.xlu1 %2091, %v306_v13   ;;  %2090 = vset.pattern.permute.xlu0 %v2143_v18 }
   0xe   :  { %593 = vperm.xlu0 %2090, %v305_v11  }
   0xf   :  { %164 = vmatpush1.bf16.msra.mxu0 %v2107_v8 }
  0x10   :  { %165 = vmatprep.subr.bf16.mxu0 %v2108_v10 }
  0x11   :  { %601 = vperm.xlu1 %2091, %v307_v9  }
  0x12   :  { %605 = vperm.xlu0 %2090, %v308_v12  }
  0x13   :  { %166 = vmatpush1.bf16.msra.mxu0 %v2110_v14 }
  0x14   :  { %167 = vmatprep.subr.bf16.mxu0 %v2111_v15 }
  0x15   :  { %2092 = vset.pattern.permute.xlu1 %v2144_v23 }
  0x16   :  { %1116 = vperm.xlu1 %2092, %v305_v11   ;;  %2093 = vset.pattern.permute.xlu0 %v2144_v23 }
  0x17   :  { %168 = vmatpush1.bf16.msra.mxu0 %v2113_v16  ;;  %1120 = vperm.xlu0 %2093, %v306_v13  }
  0x18   :  { %169 = vmatprep.subr.bf16.mxu0 %v2114_v17 }
  0x1a   :  { %1124 = vperm.xlu1 %2092, %v307_v9  }
  0x1b   :  { %170 = vmatpush1.bf16.msra.mxu0 %v2116_v19  ;;  %2094 = vset.pattern.permute.xlu0 %v2145_v25 }
  0x1c   :  { %171 = vmatprep.subr.bf16.mxu0 %v2117_v20  ;;  %1398 = vperm.xlu0 %2094, %v305_v11  }
  0x1e   :  { %1128 = vperm.xlu1 %2092, %v308_v12  }
  0x1f   :  { %172 = vmatpush1.bf16.msra.mxu0 %v2119_v21 }
  0x20   :  { %1410 = vperm.xlu0 %2094, %v308_v12  }
  0x22   :  { %190 = vmatmul.mubr.bf16.vlgmr.msra.gmra.mxu0 %v45_v22  ;;  %2095 = vset.pattern.permute.xlu1 %v2145_v25 }
  0x23   :  { %199 = vmatprep.mubr.bf16.mxu0 %v2142_v1  ;;  %1402 = vperm.xlu1 %2095, %v306_v13  }
  0x27   :  { %1406 = vperm.xlu1 %2095, %v307_v9  }
  0x2a   :  { %200 = vmatmul.mubr.bf16.gmra.mxu0 %v47_v24 }
  0xe2   :  { %v191_v36 = vpop.f32.mrf.mxu0 }
  0xe3   :  { %v222_v37 = vmul.f32 %v215_v32, %v191_v36 }
  0xe4   :  { %v193_v40 = vpop.f32.mrf.mxu0 }
  0xe5   :  { %v242_v41 = vadd.f32 %v235_v34, %v222_v37  ;;  %v223_v42 = vmul.f32 %v219_v35, %v193_v40 }
  0xe6   :  { %v195_v44 = vpop.f32.mrf.mxu0 }
  0xe7   :  { %vm250_vm0 = vcmp.gt.f32.partialorder %v242_v41, 0.0  ;;  %v270_v45 = vmul.f32 %v263_v38, %v242_v41  ;;  %v243_v46 = vadd.f32 %v2309_v39, %v223_v42  ;;  %v224_v47 = vmul.f32 %v215_v32, %v195_v44 }
  0xe8   :  { %v197_v48 = vpop.f32.mrf.mxu0 }
  0xe9   :  { %v2315_v49 = vsel %vm250_vm0, %v242_v41, %v270_v45  ;;  %v244_v50 = vadd.f32 %v235_v34, %v224_v47  ;;  %v271_v51 = vmul.f32 %v2312_v43, %v243_v46  ;;  %v225_v52 = vmul.f32 %v219_v35, %v197_v48  ;;  %v2418_v41 = vpop.permute.xlu1 %321 }
  0xea   :  { %4531 = vst [vmem:[#allocation4_spill] sm:$0xff] %v2315_v49  ;;  %857 = vrot.lane.b32.xlu1 %v2315_v49, %s2146_s2  ;;  %v201_v53 = vpop.f32.mrf.mxu0  ;;  %vm251_vm1 = vcmp.gt.f32.partialorder %v243_v46, 0.0  ;;  %v1380_v61 = vrot.slane %v2315_v49, 2  ;;  %v1098_v23 = vrot.slane %v2315_v49, 1  ;;  %v286_v44 = vrot.slane %v2315_v49, 6 }
  0xeb   :  { %vm252_vm2 = vcmp.gt.f32.partialorder %v244_v50, 0.0  ;;  %v272_v54 = vmul.f32 %v263_v38, %v244_v50  ;;  %v226_v55 = vmul.f32 %v215_v32, %v201_v53  ;;  %v245_v56 = vadd.f32 %v2309_v39, %v225_v52  ;;  %v2441_v52 = vpop.permute.xlu0 %311 }
  0xec   :  { %v203_v57 = vpop.f32.mrf.mxu0  ;;  %v2325_v62 = vsel %vm251_vm1, %v243_v46, %v271_v51  ;;  %v575_v45 = vrot.slane %v2315_v49, 7 }
  0xed   :  { %v2322_v58 = vsel %vm252_vm2, %v244_v50, %v272_v54  ;;  %v246_v59 = vadd.f32 %v235_v34, %v226_v55  ;;  %v227_v60 = vmul.f32 %v219_v35, %v203_v57  ;;  %4532 = vst [vmem:[#allocation5_spill] sm:$0xff] %v2325_v62  ;;  %vm253_vm4 = vcmp.gt.f32.partialorder %v245_v56, 0.0  ;;  %v2439_v51 = vpop.permute.xlu1 %326 }
  0xee   :  { %v273_v63 = vmul.f32 %v2312_v43, %v245_v56  ;;  %910 = vrot.lane.b32.xlu1 %v2315_v49, %s2147_s3  ;;  %859 = vrot.lane.b32.xlu0 %v2322_v58, %s2146_s2  ;;  %v205_v0 = vpop.f32.mrf.mxu0  ;;  %v1382_v1 = vrot.slane %v2322_v58, 2  ;;  %v1381_v10 = vrot.slane %v2325_v62, 2  ;;  %v1100_v11 = vrot.slane %v2322_v58, 1 }
  0xef   :  { %vm254_vm5 = vcmp.gt.f32.partialorder %v246_v59, 0.0  ;;  %v274_v2 = vmul.f32 %v263_v38, %v246_v59  ;;  %v247_v3 = vadd.f32 %v2309_v39, %v227_v60  ;;  %v228_v4 = vmul.f32 %v215_v32, %v205_v0 }
  0xf0   :  { %v2334_v5 = vsel %vm253_vm4, %v245_v56, %v273_v63  ;;  %v2338_v6 = vsel %vm1388_vm3, %v1380_v61, %v1382_v1  ;;  %v207_v7 = vpop.f32.mrf.mxu0  ;;  %v288_v46 = vrot.slane %v2322_v58, 6  ;;  %v287_v57 = vrot.slane %v2325_v62, 6 }
  0xf1   :  { %v2340_v8 = vsel %vm254_vm5, %v246_v59, %v274_v2  ;;  %vm255_vm6 = vcmp.gt.f32.partialorder %v247_v3, 0.0  ;;  %v275_v9 = vmul.f32 %v2312_v43, %v247_v3  ;;  %v248_v13 = vadd.f32 %v235_v34, %v228_v4 }
  0xf2   :  { %4533 = vst [vmem:[#allocation6_spill] sm:$0xff] %v2340_v8  ;;  %v1102_v12 = vrot.slane %v2340_v8, 1  ;;  %v1383_v14 = vrot.slane %v2334_v5, 2  ;;  %992 = vrot.lane.b32.xlu1 %v2315_v49, %s2148_s4  ;;  %912 = vrot.lane.b32.xlu0 %v2322_v58, %s2147_s3  ;;  %v229_v16 = vmul.f32 %v219_v35, %v207_v7  ;;  %v1384_v17 = vrot.slane %v2340_v8, 2 }
  0xf3   :  { %v2352_v15 = vsel %vm255_vm6, %v247_v3, %v275_v9  ;;  %vm256_vm8 = vcmp.gt.f32.partialorder %v248_v13, 0.0  ;;  %v276_v19 = vmul.f32 %v263_v38, %v248_v13  ;;  %v578_v42 = vrot.slane %v2334_v5, 7 }
  0xf4   :  { %4534 = vst [vmem:[#allocation7_spill] sm:$0xff] %v2352_v15  ;;  %v2359_v18 = vsel %vm1106_vm7, %v1100_v11, %v1102_v12  ;;  %v2363_v20 = vsel %vm1388_vm3, %v1381_v10, %v1383_v14  ;;  %v249_v21 = vadd.f32 %v2309_v39, %v229_v16  ;;  %v1385_v22 = vrot.slane %v2352_v15, 2 }
  0xf5   :  { %v2368_v24 = vsel %vm256_vm8, %v248_v13, %v276_v19  ;;  %v2372_v25 = vsel %vm1388_vm3, %v1382_v1, %v1384_v17  ;;  %v1101_v47 = vrot.slane %v2334_v5, 1  ;;  %v1103_v50 = vrot.slane %v2352_v15, 1  ;;  %v598_v13 = vpop.permute.xlu1 %597 }
  0xf6   :  { %4535 = vst [vmem:[#allocation8_spill] sm:$0xff] %v2368_v24  ;;  %4536 = vst [vmem:[#allocation9_spill] sm:$0xff] %v2372_v25  ;;  %1045 = vrot.lane.b32.xlu1 %v2315_v49, %s2149_s22  ;;  %994 = vrot.lane.b32.xlu0 %v2322_v58, %s2148_s4  ;;  %v1104_v29 = vrot.slane %v2368_v24, 1  ;;  %vm257_vm9 = vcmp.gt.f32.partialorder %v249_v21, 0.0  ;;  %v277_v31 = vmul.f32 %v2312_v43, %v249_v21  ;;  %v1386_v33 = vrot.slane %v2368_v24, 2 }
  0xf7   :  { %v2382_v32 = vsel %vm1388_vm3, %v1383_v14, %v1385_v22  ;;  %v580_v43 = vrot.slane %v2352_v15, 7  ;;  %v290_v53 = vrot.slane %v2340_v8, 6  ;;  %v292_v54 = vrot.slane %v2368_v24, 6  ;;  %v317_v14 = vpop.permute.xlu0 %316  ;;  %v1996_v25 = vld [vmem:[%s4395_s5 + $0x6] ss:$8 sm:$0x3] }
  0xf8   :  { %4537 = vst [vmem:[#allocation10_spill] sm:$0xff] %v2382_v32  ;;  %v2389_v34 = vsel %vm1106_vm7, %v1104_v29, %v1098_v23  ;;  %v2391_v35 = vsel %vm257_vm9, %v249_v21, %v277_v31  ;;  %v2396_v37 = vsel %vm1388_vm3, %v1386_v33, %v1380_v61  ;;  %v2404_v38 = vsel %vm1388_vm3, %v1384_v17, %v1386_v33 }
  0xf9   :  { %4538 = vst [vmem:[#allocation11_spill] sm:$0xff] %v2391_v35  ;;  %v1387_v36 = vrot.slane %v2391_v35, 2  ;;  %4539 = vst [vmem:[#allocation12_spill] sm:$0xff] %v2396_v37  ;;  %v2436_v48 = vsel %vm583_vm11, %v578_v42, %v580_v43  ;;  %v581_v55 = vrot.slane %v2368_v24, 7  ;;  %v2448_v56 = vsel %vm1106_vm7, %v1102_v12, %v1104_v29  ;;  %v2528_v33 = vpop.permute.xlu1 %601 }
  0xfa   :  { %865 = vrot.lane.b32.xlu1 %v2325_v62, %s2146_s2  ;;  %1047 = vrot.lane.b32.xlu0 %v2322_v58, %s2149_s22  ;;  %4540 = vst [vmem:[#allocation13_spill] sm:$0xff] %v2404_v38  ;;  %v579_v59 = vrot.slane %v2340_v8, 7  ;;  %v2460_v60 = vsel %vm1106_vm7, %v1101_v47, %v1103_v50  ;;  %v293_v61 = vrot.slane %v2391_v35, 6  ;;  %v291_v63 = vrot.slane %v2352_v15, 6 }
  0xfb   :  { %v2408_v39 = vsel %vm1388_vm3, %v1387_v36, %v1381_v10  ;;  %v2412_v40 = vsel %vm1388_vm3, %v1385_v22, %v1387_v36  ;;  %v2466_v0 = vsel %vm296_vm10, %v292_v54, %v286_v44  ;;  %v2472_v1 = vsel %vm296_vm10, %v290_v53, %v292_v54 }
  0xfc   :  { %4541 = vst [vmem:[#allocation14_spill] sm:$0xff] %v2408_v39  ;;  %4542 = vst [vmem:[#allocation15_spill] sm:$0xff] %v2412_v40  ;;  %v2476_v2 = vsel %vm583_vm11, %v581_v55, %v575_v45  ;;  %v2482_v3 = vsel %vm583_vm11, %v579_v59, %v581_v55  ;;  %v301_v4 = vsel %vm296_vm10, %v286_v44, %v288_v46  ;;  %v576_v10 = vrot.slane %v2325_v62, 7 }
  0xfd   :  { %v2490_v7 = vsel %vm296_vm10, %v293_v61, %v287_v57  ;;  %v2496_v9 = vsel %vm296_vm10, %v291_v63, %v293_v61  ;;  %v582_v12 = vrot.slane %v2391_v35, 7  ;;  %v1099_v16 = vrot.slane %v2325_v62, 1  ;;  %v1117_v44 = vpop.permute.xlu1 %1116 }
  0xfe   :  { %918 = vrot.lane.b32.xlu1 %v2325_v62, %s2147_s3  ;;  %867 = vrot.lane.b32.xlu0 %v2334_v5, %s2146_s2  ;;  %v1105_v17 = vrot.slane %v2391_v35, 1  ;;  %v2506_v19 = vmul.f32 %v317_v14, %v301_v4  ;;  %v1111_v36 = vsel %vm1106_vm7, %v1098_v23, %v1100_v11  ;;  %v289_v23 = vrot.slane %v2334_v5, 6 }
  0xff   :  { %v2510_v21 = vsel %vm583_vm11, %v582_v12, %v576_v10  ;;  %v2514_v22 = vsel %vm583_vm11, %v580_v43, %v582_v12  ;;  %v577_v43 = vrot.slane %v2322_v58, 7  ;;  %v1112_v61 = vsel %vm1106_vm7, %v1099_v16, %v1101_v47 }
 0x100   :  { %v2518_v29 = vsel %vm1106_vm7, %v1103_v50, %v1105_v17  ;;  %v2522_v31 = vsel %vm1106_vm7, %v1105_v17, %v1099_v16  ;;  %v2545_v50 = vmul.f32 %v1117_v44, %v1111_v36  ;;  %v589_v4 = vsel %vm583_vm11, %v576_v10, %v578_v42  ;;  %v2621_v10 = vpop.permute.xlu0 %593 }
 0x101   :  { %v588_v54 = vsel %vm583_vm11, %v575_v45, %v577_v43  ;;  %v302_v45 = vsel %vm296_vm10, %v287_v57, %v289_v23  ;;  %v2588_v57 = vmul.f32 %v1117_v44, %v1112_v61  ;;  %v2602_v47 = vmul.f32 %v598_v13, %v589_v4 }
 0x102   :  { %1000 = vrot.lane.b32.xlu1 %v2325_v62, %s2148_s4  ;;  %920 = vrot.lane.b32.xlu0 %v2334_v5, %s2147_s3  ;;  %4543 = vst [vmem:[#allocation16_spill] sm:$0xff] %v2545_v50  ;;  %v2553_v11 = vmul.f32 %v598_v13, %v588_v54  ;;  %v2574_v55 = vmul.f32 %v317_v14, %v302_v45 }
 0x103   :  { %4544 = vst [vmem:[#allocation17_spill] sm:$0xff] %v2588_v57  ;;  %v299_v12 = vsel %vm296_vm10, %v288_v46, %v290_v53  ;;  %v2627_v46 = vpop.permute.xlu1 %1124  ;;  %v586_v13 = vsel %vm583_vm11, %v577_v43, %v579_v59  ;;  %v300_v61 = vsel %vm296_vm10, %v289_v23, %v291_v63 }
 0x104   :  { %v2615_v42 = vmul.f32 %v2418_v41, %v299_v12  ;;  %v2633_v53 = vpop.permute.xlu0 %605  ;;  %v2646_v16 = vmul.f32 %v2528_v33, %v586_v13 }
 0x105   :  { %v2809_v37 = vmul.f32 %v2633_v53, %v2482_v3 }
 0x106   :  { %1053 = vrot.lane.b32.xlu1 %v2325_v62, %s2149_s22  ;;  %1002 = vrot.lane.b32.xlu0 %v2334_v5, %s2148_s4  ;;  %4545 = vst [vmem:[#allocation18_spill] sm:$0xff] %v2646_v16 }
 0x107   :  { %v2639_v14 = vpop.permute.xlu1 %1128  ;;  %4572 = vst [vmem:[#allocation45_spill] sm:$0xff] %v2809_v37 }
 0x108   :  { %v1121_v17 = vpop.permute.xlu0 %1120 }
 0x109   :  { %v2667_v44 = vmul.f32 %v1121_v17, %v2359_v18  ;;  %v2686_v18 = vmul.f32 %v2418_v41, %v300_v61 }
 0x10a   :  { %1055 = vrot.lane.b32.xlu0 %v2334_v5, %s2149_s22  ;;  %861 = vrot.lane.b32.xlu1 %v2340_v8, %s2146_s2 }
 0x10b   :  { %v2652_v36 = vpop.permute.xlu1 %1402 }
 0x10c   :  { %4546 = vst [vmem:[#allocation19_spill] sm:$0xff] %v2652_v36  ;;  %v2658_v59 = vpop.permute.xlu0 %1398 }
 0x10e   :  { %339 = vrot.lane.b32.xlu0 %v2506_v19, %s2146_s2  ;;  %914 = vrot.lane.b32.xlu1 %v2340_v8, %s2147_s3 }
 0x10f   :  { %v2660_v43 = vpop.permute.xlu1 %1406 }
 0x110   :  { %4547 = vst [vmem:[#allocation20_spill] sm:$0xff] %v2660_v43  ;;  %v2669_v54 = vpop.permute.xlu0 %1410  ;;  %v1991_v43 = vld [vmem:[%s4395_s5 + $0x1] ss:$8 sm:$0x3] }
 0x111   :  { %4548 = vst [vmem:[#allocation21_spill] sm:$0xff] %v2669_v54 }
 0x112   :  { %386 = vrot.lane.b32.xlu0 %v2506_v19, %s2147_s3  ;;  %996 = vrot.lane.b32.xlu1 %v2340_v8, %s2148_s4 }
 0x116   :  { %469 = vrot.lane.b32.xlu0 %v2506_v19, %s2148_s4  ;;  %1049 = vrot.lane.b32.xlu1 %v2340_v8, %s2149_s22  ;;  %v1994_v8 = vld [vmem:[%s4395_s5 + $0x4] ss:$8 sm:$0x3] }
 0x11a   :  { %523 = vrot.lane.b32.xlu0 %v2506_v19, %s2149_s22  ;;  %1139 = vrot.lane.b32.xlu1 %v2545_v50, %s2146_s2 }
 0x11e   :  { %618 = vrot.lane.b32.xlu0 %v2553_v11, %s2146_s2  ;;  %1192 = vrot.lane.b32.xlu1 %v2545_v50, %s2147_s3 }
 0x122   :  { %671 = vrot.lane.b32.xlu0 %v2553_v11, %s2147_s3  ;;  %1274 = vrot.lane.b32.xlu1 %v2545_v50, %s2148_s4 }
 0x126   :  { %753 = vrot.lane.b32.xlu0 %v2553_v11, %s2148_s4  ;;  %869 = vrot.lane.b32.xlu1 %v2352_v15, %s2146_s2 }
 0x12a   :  { %806 = vrot.lane.b32.xlu0 %v2553_v11, %s2149_s22  ;;  %922 = vrot.lane.b32.xlu1 %v2352_v15, %s2147_s3 }
 0x12e   :  { %347 = vrot.lane.b32.xlu0 %v2574_v55, %s2146_s2  ;;  %1004 = vrot.lane.b32.xlu1 %v2352_v15, %s2148_s4 }
 0x132   :  { %394 = vrot.lane.b32.xlu0 %v2574_v55, %s2147_s3  ;;  %1057 = vrot.lane.b32.xlu1 %v2352_v15, %s2149_s22 }
 0x136   :  { %477 = vrot.lane.b32.xlu0 %v2574_v55, %s2148_s4  ;;  %1147 = vrot.lane.b32.xlu1 %v2588_v57, %s2146_s2 }
 0x13a   :  { %531 = vrot.lane.b32.xlu0 %v2574_v55, %s2149_s22  ;;  %1200 = vrot.lane.b32.xlu1 %v2588_v57, %s2147_s3 }
 0x13e   :  { %626 = vrot.lane.b32.xlu0 %v2602_v47, %s2146_s2  ;;  %1282 = vrot.lane.b32.xlu1 %v2588_v57, %s2148_s4 }
 0x142   :  { %679 = vrot.lane.b32.xlu0 %v2602_v47, %s2147_s3  ;;  %341 = vrot.lane.b32.xlu1 %v2615_v42, %s2146_s2 }
 0x146   :  { %761 = vrot.lane.b32.xlu0 %v2602_v47, %s2148_s4  ;;  %388 = vrot.lane.b32.xlu1 %v2615_v42, %s2147_s3 }
 0x14a   :  { %814 = vrot.lane.b32.xlu0 %v2602_v47, %s2149_s22  ;;  %471 = vrot.lane.b32.xlu1 %v2615_v42, %s2148_s4 }
 0x14e   :  { %525 = vrot.lane.b32.xlu1 %v2615_v42, %s2149_s22  ;;  %863 = vrot.lane.b32.xlu0 %v2368_v24, %s2146_s2 }
 0x152   :  { %620 = vrot.lane.b32.xlu1 %v2646_v16, %s2146_s2  ;;  %916 = vrot.lane.b32.xlu0 %v2368_v24, %s2147_s3 }
 0x156   :  { %673 = vrot.lane.b32.xlu1 %v2646_v16, %s2147_s3  ;;  %998 = vrot.lane.b32.xlu0 %v2368_v24, %s2148_s4 }
 0x15a   :  { %755 = vrot.lane.b32.xlu1 %v2646_v16, %s2148_s4  ;;  %1051 = vrot.lane.b32.xlu0 %v2368_v24, %s2149_s22 }
 0x15c   :  { %v2671_v45 = vpop.permute.xlu1 %857 }
 0x15d   :  { %4549 = vst [vmem:[#allocation22_spill] sm:$0xff] %v2671_v45  ;;  %v2769_v45 = vmul.f32 %v2439_v51, %v2472_v1 }
 0x15e   :  { %808 = vrot.lane.b32.xlu1 %v2646_v16, %s2149_s22  ;;  %1141 = vrot.lane.b32.xlu0 %v2667_v44, %s2146_s2 }
 0x15f   :  { %4566 = vst [vmem:[#allocation39_spill] sm:$0xff] %v2769_v45 }
 0x160   :  { %v2681_v4 = vpop.permute.xlu1 %910  ;;  %v2683_v12 = vpop.permute.xlu0 %859 }
 0x161   :  { %4550 = vst [vmem:[#allocation23_spill] sm:$0xff] %v2681_v4 }
 0x162   :  { %349 = vrot.lane.b32.xlu1 %v2686_v18, %s2146_s2  ;;  %1194 = vrot.lane.b32.xlu0 %v2667_v44, %s2147_s3 }
 0x164   :  { %v2692_v27 = vpop.permute.xlu1 %992  ;;  %v2694_v63 = vpop.permute.xlu0 %912 }
 0x165   :  { %4551 = vst [vmem:[#allocation24_spill] sm:$0xff] %v2692_v27  ;;  %v2722_v27 = vmul.f32 %v2528_v33, %v2436_v48  ;;  %v2741_v33 = vmul.f32 %v1121_v17, %v2460_v60  ;;  %v2759_v60 = vmul.f32 %v2441_v52, %v2466_v0 }
 0x166   :  { %396 = vrot.lane.b32.xlu1 %v2686_v18, %s2147_s3  ;;  %1276 = vrot.lane.b32.xlu0 %v2667_v44, %s2148_s4 }
 0x167   :  { %4557 = vst [vmem:[#allocation30_spill] sm:$0xff] %v2722_v27  ;;  %4564 = vst [vmem:[#allocation37_spill] sm:$0xff] %v2759_v60 }
 0x168   :  { %v2700_v23 = vpop.permute.xlu1 %1045  ;;  %v2702_v41 = vpop.permute.xlu0 %994 }
 0x169   :  { %4552 = vst [vmem:[#allocation25_spill] sm:$0xff] %v2700_v23  ;;  %4553 = vst [vmem:[#allocation26_spill] sm:$0xff] %v2702_v41 }
 0x16a   :  { %479 = vrot.lane.b32.xlu1 %v2686_v18, %s2148_s4  ;;  %871 = vrot.lane.b32.xlu0 %v2391_v35, %s2146_s2 }
 0x16c   :  { %v2708_v13 = vpop.permute.xlu1 %865  ;;  %v2710_v61 = vpop.permute.xlu0 %1047 }
 0x16d   :  { %4554 = vst [vmem:[#allocation27_spill] sm:$0xff] %v2708_v13  ;;  %4555 = vst [vmem:[#allocation28_spill] sm:$0xff] %v2710_v61  ;;  %v2872_v61 = vmul.f32 %v2439_v51, %v2496_v9 }
 0x16e   :  { %533 = vrot.lane.b32.xlu1 %v2686_v18, %s2149_s22  ;;  %924 = vrot.lane.b32.xlu0 %v2391_v35, %s2147_s3 }
 0x16f   :  { %4581 = vst [vmem:[#allocation53_spill] sm:$0xff] %v2872_v61 }
 0x170   :  { %v2716_v26 = vpop.permute.xlu1 %918  ;;  %v2718_v23 = vpop.permute.xlu0 %867 }
 0x171   :  { %4556 = vst [vmem:[#allocation29_spill] sm:$0xff] %v2716_v26 }
 0x172   :  { %628 = vrot.lane.b32.xlu1 %v2722_v27, %s2146_s2  ;;  %1006 = vrot.lane.b32.xlu0 %v2391_v35, %s2148_s4 }
 0x174   :  { %v2728_v4 = vpop.permute.xlu1 %1000  ;;  %v2730_v24 = vpop.permute.xlu0 %920 }
 0x175   :  { %4558 = vst [vmem:[#allocation31_spill] sm:$0xff] %v2728_v4 }
 0x176   :  { %681 = vrot.lane.b32.xlu1 %v2722_v27, %s2147_s3  ;;  %1059 = vrot.lane.b32.xlu0 %v2391_v35, %s2149_s22 }
 0x178   :  { %v2736_v26 = vpop.permute.xlu1 %1053  ;;  %v2738_v48 = vpop.permute.xlu0 %1002 }
 0x179   :  { %4559 = vst [vmem:[#allocation32_spill] sm:$0xff] %v2736_v26  ;;  %4560 = vst [vmem:[#allocation33_spill] sm:$0xff] %v2738_v48 }
 0x17a   :  { %763 = vrot.lane.b32.xlu1 %v2722_v27, %s2148_s4  ;;  %1149 = vrot.lane.b32.xlu0 %v2741_v33, %s2146_s2 }
 0x17c   :  { %v2747_v4 = vpop.permute.xlu0 %1055  ;;  %v2749_v62 = vpop.permute.xlu1 %861 }
 0x17d   :  { %4561 = vst [vmem:[#allocation34_spill] sm:$0xff] %v2747_v4  ;;  %4562 = vst [vmem:[#allocation35_spill] sm:$0xff] %v2749_v62 }
 0x17e   :  { %816 = vrot.lane.b32.xlu1 %v2722_v27, %s2149_s22  ;;  %1202 = vrot.lane.b32.xlu0 %v2741_v33, %s2147_s3 }
 0x180   :  { %v340_v26 = vpop.permute.xlu0 %339  ;;  %v2755_v35 = vpop.permute.xlu1 %914 }
 0x181   :  { %4563 = vst [vmem:[#allocation36_spill] sm:$0xff] %v2755_v35  ;;  %v2841_v35 = vmul.f32 %v2627_v46, %v2448_v56 }
 0x182   :  { %337 = vrot.lane.b32.xlu1 %v2759_v60, %s2146_s2  ;;  %1284 = vrot.lane.b32.xlu0 %v2741_v33, %s2148_s4 }
 0x183   :  { %4577 = vst [vmem:[#allocation49_spill] sm:$0xff] %v2841_v35 }
 0x184   :  { %v387_v17 = vpop.permute.xlu0 %386  ;;  %v2765_v49 = vpop.permute.xlu1 %996 }
 0x185   :  { %4565 = vst [vmem:[#allocation38_spill] sm:$0xff] %v2765_v49 }
 0x186   :  { %384 = vrot.lane.b32.xlu1 %v2759_v60, %s2147_s3  ;;  %343 = vrot.lane.b32.xlu0 %v2769_v45, %s2146_s2 }
 0x188   :  { %v2775_v0 = vpop.permute.xlu0 %469  ;;  %v2777_v13 = vpop.permute.xlu1 %1049 }
 0x189   :  { %4567 = vst [vmem:[#allocation40_spill] sm:$0xff] %v2777_v13  ;;  %v2797_v13 = vmul.f32 %v2621_v10, %v2476_v2 }
 0x18a   :  { %467 = vrot.lane.b32.xlu1 %v2759_v60, %s2148_s4  ;;  %390 = vrot.lane.b32.xlu0 %v2769_v45, %s2147_s3 }
 0x18b   :  { %4570 = vst [vmem:[#allocation43_spill] sm:$0xff] %v2797_v13 }
 0x18c   :  { %v2783_v49 = vpop.permute.xlu0 %523  ;;  %v2785_v1 = vpop.permute.xlu1 %1139 }
 0x18d   :  { %4568 = vst [vmem:[#allocation41_spill] sm:$0xff] %v2785_v1 }
 0x18e   :  { %521 = vrot.lane.b32.xlu1 %v2759_v60, %s2149_s22  ;;  %473 = vrot.lane.b32.xlu0 %v2769_v45, %s2148_s4 }
 0x190   :  { %v2791_v39 = vpop.permute.xlu0 %618  ;;  %v2793_v54 = vpop.permute.xlu1 %1192 }
 0x191   :  { %4569 = vst [vmem:[#allocation42_spill] sm:$0xff] %v2793_v54 }
 0x192   :  { %616 = vrot.lane.b32.xlu1 %v2797_v13, %s2146_s2  ;;  %527 = vrot.lane.b32.xlu0 %v2769_v45, %s2149_s22  ;;  %v4575_v45 = vlaneseq }
 0x194   :  { %v2803_v1 = vpop.permute.xlu0 %671  ;;  %v2805_v60 = vpop.permute.xlu1 %1274  ;;  %v2830_v40 = vand.u32 127, %v4575_v45  ;;  %v2849_v45 = vrot.slane %v1991_v43, %v2290_v28 }
 0x195   :  { %4571 = vst [vmem:[#allocation44_spill] sm:$0xff] %v2805_v60 }
 0x196   :  { %669 = vrot.lane.b32.xlu1 %v2797_v13, %s2147_s3  ;;  %622 = vrot.lane.b32.xlu0 %v2809_v37, %s2146_s2  ;;  %vm355_vm12 = vcmp.lt.s32.totalorder %v2830_v40, 32  ;;  %vm400_vm13 = vcmp.lt.s32.totalorder %v2830_v40, 16  ;;  %vm483_vm14 = vcmp.lt.s32.totalorder %v2830_v40, 112  ;;  %vm537_vm15 = vcmp.lt.s32.totalorder %v2830_v40, 96 }
 0x198   :  { %v2815_v2 = vpop.permute.xlu0 %753  ;;  %v2817_v54 = vpop.permute.xlu1 %869 }
 0x199   :  { %4573 = vst [vmem:[#allocation46_spill] sm:$0xff] %v2817_v54 }
 0x19a   :  { %751 = vrot.lane.b32.xlu1 %v2797_v13, %s2148_s4  ;;  %675 = vrot.lane.b32.xlu0 %v2809_v37, %s2147_s3 }
 0x19c   :  { %v2823_v60 = vpop.permute.xlu0 %806  ;;  %v2825_v3 = vpop.permute.xlu1 %922 }
 0x19d   :  { %4574 = vst [vmem:[#allocation47_spill] sm:$0xff] %v2825_v3  ;;  %v2852_v3 = vrot.slane %v1991_v43, %v2296_v30  ;;  %v2868_v43 = vmul.f32 %v2441_v52, %v2490_v7  ;;  %v1992_v52 = vld [vmem:[%s4395_s5 + $0x2] ss:$8 sm:$0x3] }
 0x19e   :  { %804 = vrot.lane.b32.xlu1 %v2797_v13, %s2149_s22  ;;  %757 = vrot.lane.b32.xlu0 %v2809_v37, %s2148_s4  ;;  %v364_v13 = vld [vmem:[%s4395_s5] ss:$8 sm:$0x3]  ;;  %v2897_v9 = vrot.slane %v1992_v52, %v2290_v28 }
 0x19f   :  { %4578 = vst [vmem:[#allocation50_spill] sm:$0xff] %v2852_v3  ;;  %v2859_v56 = vrot.slane %v364_v13, %v2290_v28  ;;  %4580 = vst [vmem:[#allocation52_spill] sm:$0xff] %v2868_v43 }
 0x1a0   :  { %v348_v38 = vpop.permute.xlu0 %347  ;;  %v2837_v15 = vpop.permute.xlu1 %1004 }
 0x1a1   :  { %4576 = vst [vmem:[#allocation48_spill] sm:$0xff] %v2837_v15  ;;  %v2862_v15 = vrot.slane %v364_v13, %v2296_v30  ;;  %v361_v4 = vsel %vm355_vm12, %v348_v38, %v340_v26 }
 0x1a2   :  { %1143 = vrot.lane.b32.xlu1 %v2841_v35, %s2146_s2  ;;  %810 = vrot.lane.b32.xlu0 %v2809_v37, %s2149_s22  ;;  %v357_v37 = vsel %vm355_vm12, %v340_v26, %v348_v38  ;;  %v1993_v26 = vld [vmem:[%s4395_s5 + $0x3] ss:$8 sm:$0x3] }
 0x1a3   :  { %v379_v38 = vmul.f32 %v2862_v15, %v357_v37  ;;  %v2912_v37 = vrot.slane %v1993_v26, %v2296_v30 }
 0x1a4   :  { %v395_v62 = vpop.permute.xlu0 %394  ;;  %v2864_v54 = vpop.permute.xlu1 %1057 }
 0x1a5   :  { %4579 = vst [vmem:[#allocation51_spill] sm:$0xff] %v2864_v54  ;;  %v402_v13 = vsel %vm400_vm13, %v387_v17, %v395_v62  ;;  %v406_v54 = vsel %vm400_vm13, %v395_v62, %v387_v17  ;;  %v378_v62 = vmul.f32 %v2859_v56, %v361_v4  ;;  %v2909_v4 = vrot.slane %v1993_v26, %v2290_v28 }
 0x1a6   :  { %v424_v7 = vmul.f32 %v2849_v45, %v406_v54  ;;  %v425_v51 = vmul.f32 %v2852_v3, %v402_v13  ;;  %345 = vrot.lane.b32.xlu1 %v2868_v43, %s2146_s2  ;;  %351 = vrot.lane.b32.xlu0 %v2872_v61, %s2146_s2  ;;  %v2900_v54 = vrot.slane %v1992_v52, %v2296_v30  ;;  %v1995_v52 = vld [vmem:[%s4395_s5 + $0x5] ss:$8 sm:$0x3] }
 0x1a7   :  { %4583 = vst [vmem:[#allocation55_spill] sm:$0xff] %v2909_v4  ;;  %4584 = vst [vmem:[#allocation56_spill] sm:$0xff] %v2912_v37  ;;  %v453_v26 = vmul.f32 %v2897_v9, %v2506_v19 }
 0x1a8   :  { %v478_v17 = vpop.permute.xlu0 %477  ;;  %v2902_v13 = vpop.permute.xlu1 %1147  ;;  %v432_v27 = vadd.f32 %v424_v7, %v378_v62  ;;  %v433_v16 = vadd.f32 %v425_v51, %v379_v38  ;;  %v454_v62 = vmul.f32 %v2900_v54, %v2574_v55  ;;  %v2933_v38 = vrot.slane %v1994_v8, %v2290_v28 }
 0x1a9   :  { %4582 = vst [vmem:[#allocation54_spill] sm:$0xff] %v2902_v13  ;;  %v485_v7 = vsel %vm483_vm14, %v2775_v0, %v478_v17  ;;  %v489_v51 = vsel %vm483_vm14, %v478_v17, %v2775_v0  ;;  %v2936_v13 = vrot.slane %v1994_v8, %v2296_v30  ;;  %v2947_v17 = vrot.slane %v1995_v52, %v2290_v28 }
 0x1aa   :  { %392 = vrot.lane.b32.xlu1 %v2868_v43, %s2147_s3  ;;  %398 = vrot.lane.b32.xlu0 %v2872_v61, %s2147_s3  ;;  %4585 = vst [vmem:[#allocation57_spill] sm:$0xff] %v2933_v38  ;;  %v2950_v55 = vrot.slane %v1995_v52, %v2296_v30  ;;  %v461_v32 = vadd.f32 %v453_v26, %v432_v27  ;;  %v1997_v52 = vld [vmem:[%s4395_s5 + $0x7] ss:$8 sm:$0x3] }
 0x1ab   :  { %4586 = vst [vmem:[#allocation58_spill] sm:$0xff] %v2936_v13  ;;  %4588 = vst [vmem:[#allocation60_spill] sm:$0xff] %v2947_v17  ;;  %v462_v8 = vadd.f32 %v454_v62, %v433_v16  ;;  %v507_v36 = vmul.f32 %v2909_v4, %v485_v7  ;;  %v2975_v26 = vrot.slane %v1996_v25, %v2290_v28 }
 0x1ac   :  { %v532_v41 = vpop.permute.xlu0 %531  ;;  %v2938_v48 = vpop.permute.xlu1 %1200  ;;  %4589 = vst [vmem:[#allocation61_spill] sm:$0xff] %v2950_v55  ;;  %v2978_v62 = vrot.slane %v1996_v25, %v2296_v30  ;;  %v2993_v25 = vrot.slane %v1997_v52, %v2296_v30 }
 0x1ad   :  { %4587 = vst [vmem:[#allocation59_spill] sm:$0xff] %v2938_v48  ;;  %v539_v0 = vsel %vm537_vm15, %v2783_v49, %v532_v41  ;;  %v543_v19 = vsel %vm537_vm15, %v532_v41, %v2783_v49  ;;  %v508_v48 = vmul.f32 %v2912_v37, %v489_v51  ;;  %4591 = vst [vmem:[#allocation63_spill] sm:$0xff] %v2975_v26 }
 0x1ae   :  { %475 = vrot.lane.b32.xlu1 %v2868_v43, %s2148_s4  ;;  %481 = vrot.lane.b32.xlu0 %v2872_v61, %s2148_s4  ;;  %v561_v49 = vmul.f32 %v2933_v38, %v539_v0  ;;  %v562_v41 = vmul.f32 %v2936_v13, %v543_v19  ;;  %4592 = vst [vmem:[#allocation64_spill] sm:$0xff] %v2978_v62  ;;  %v1998_v38 = vld [vmem:[%s4395_s5 + $0x10] ss:$8 sm:$0x3] }
 0x1af   :  { %v515_v0 = vadd.f32 %v507_v36, %v461_v32  ;;  %v516_v19 = vadd.f32 %v508_v48, %v462_v8 }
 0x1b0   :  { %v627_v27 = vpop.permute.xlu0 %626  ;;  %v2963_v16 = vpop.permute.xlu1 %1282 }
 0x1b1   :  { %4590 = vst [vmem:[#allocation62_spill] sm:$0xff] %v2963_v16  ;;  %v633_v7 = vsel %vm355_vm12, %v2791_v39, %v627_v27  ;;  %v637_v51 = vsel %vm355_vm12, %v627_v27, %v2791_v39  ;;  %v2990_v39 = vrot.slane %v1997_v52, %v2290_v28  ;;  %v569_v32 = vadd.f32 %v561_v49, %v515_v0 }
 0x1b2   :  { %v655_v16 = vmul.f32 %v2947_v17, %v637_v51  ;;  %v656_v13 = vmul.f32 %v2950_v55, %v633_v7  ;;  %529 = vrot.lane.b32.xlu1 %v2868_v43, %s2149_s22  ;;  %535 = vrot.lane.b32.xlu0 %v2872_v61, %s2149_s22  ;;  %v570_v36 = vadd.f32 %v562_v41, %v516_v19 }
 0x1b3   :  { %v2999_v27 = vmul.f32 %v2621_v10, %v2510_v21  ;;  %v3003_v7 = vmul.f32 %v2633_v53, %v2514_v22  ;;  %v3012_v41 = vrot.slane %v1998_v38, %v2290_v28  ;;  %v3015_v52 = vrot.slane %v1998_v38, %v2296_v30  ;;  %v1999_v53 = vld [vmem:[%s4395_s5 + $0x11] ss:$8 sm:$0x3] }
 0x1b4   :  { %v680_v48 = vpop.permute.xlu0 %679  ;;  %v2995_v8 = vpop.permute.xlu1 %341  ;;  %v663_v21 = vadd.f32 %v655_v16, %v569_v32  ;;  %v664_v10 = vadd.f32 %v656_v13, %v570_v36  ;;  %v737_v38 = vmul.f32 %v2990_v39, %v2553_v11  ;;  %v738_v13 = vmul.f32 %v2993_v25, %v2602_v47  ;;  %v2000_v36 = vld [vmem:[%s4395_s5 + $0x12] ss:$8 sm:$0x3] }
 0x1b5   :  { %v686_v51 = vsel %vm400_vm13, %v2803_v1, %v680_v48  ;;  %v690_v49 = vsel %vm400_vm13, %v680_v48, %v2803_v1  ;;  %4593 = vst [vmem:[#allocation65_spill] sm:$0xff] %v3015_v52  ;;  %v3042_v11 = vrot.slane %v1999_v53, %v2290_v28  ;;  %v3045_v47 = vrot.slane %v1999_v53, %v2296_v30  ;;  %v2001_v53 = vld [vmem:[%s4395_s5 + $0x13] ss:$8 sm:$0x3] }
 0x1b6   :  { %v708_v0 = vmul.f32 %v2975_v26, %v690_v49  ;;  %v709_v22 = vmul.f32 %v2978_v62, %v686_v51  ;;  %624 = vrot.lane.b32.xlu1 %v2999_v27, %s2146_s2  ;;  %630 = vrot.lane.b32.xlu0 %v3003_v7, %s2146_s2 }
 0x1b7   :  { %4594 = vst [vmem:[#allocation66_spill] sm:$0xff] %v3042_v11  ;;  %4595 = vst [vmem:[#allocation67_spill] sm:$0xff] %v3045_v47 }
 0x1b8   :  { %v716_v1 = vadd.f32 %v708_v0, %v663_v21  ;;  %v717_v19 = vadd.f32 %v709_v22, %v664_v10  ;;  %v762_v16 = vpop.permute.xlu0 %761  ;;  %v3030_v32 = vpop.permute.xlu1 %388  ;;  %v3057_v22 = vrot.slane %v2000_v36, %v2296_v30 }
 0x1b9   :  { %v768_v48 = vsel %vm483_vm14, %v2815_v2, %v762_v16  ;;  %v772_v51 = vsel %vm483_vm14, %v762_v16, %v2815_v2  ;;  %v3054_v2 = vrot.slane %v2000_v36, %v2290_v28 }
 0x1ba   :  { %v745_v49 = vadd.f32 %v737_v38, %v716_v1  ;;  %v746_v21 = vadd.f32 %v738_v13, %v717_v19  ;;  %v790_v10 = vmul.f32 %v3012_v41, %v768_v48  ;;  %v791_v0 = vmul.f32 %v3015_v52, %v772_v51  ;;  %677 = vrot.lane.b32.xlu1 %v2999_v27, %s2147_s3 }
 0x1bb   :  { %683 = vrot.lane.b32.xlu0 %v3003_v7, %s2147_s3  ;;  %v874_v38 = vsel %vm355_vm12, %v2683_v12, %v2718_v23  ;;  %v878_v13 = vsel %vm355_vm12, %v2718_v23, %v2683_v12  ;;  %v2002_v12 = vld [vmem:[%s4395_s5 + $0x14] ss:$8 sm:$0x3]  ;;  %v3086_v23 = vrot.slane %v2001_v53, %v2290_v28  ;;  %v3089_v52 = vrot.slane %v2001_v53, %v2296_v30 }
 0x1bc   :  { %v815_v1 = vpop.permute.xlu0 %814  ;;  %v3062_v19 = vpop.permute.xlu1 %471  ;;  %v798_v48 = vadd.f32 %v790_v10, %v745_v49  ;;  %v799_v51 = vadd.f32 %v791_v0, %v746_v21  ;;  %v931_v49 = vsel %vm400_vm13, %v2730_v24, %v2694_v63  ;;  %v896_v21 = vmul.f32 %v3054_v2, %v878_v13 }
 0x1bd   :  { %v821_v16 = vsel %vm537_vm15, %v2823_v60, %v815_v1  ;;  %v825_v36 = vsel %vm537_vm15, %v815_v1, %v2823_v60  ;;  %v927_v60 = vsel %vm400_vm13, %v2694_v63, %v2730_v24  ;;  %v897_v10 = vmul.f32 %v3057_v22, %v874_v38 }
 0x1be   :  { %v843_v61 = vmul.f32 %v3042_v11, %v821_v16  ;;  %v844_v43 = vmul.f32 %v3045_v47, %v825_v36  ;;  %759 = vrot.lane.b32.xlu1 %v2999_v27, %s2148_s4  ;;  %v3108_v36 = vrot.slane %v2002_v12, %v2290_v28  ;;  %v3111_v47 = vrot.slane %v2002_v12, %v2296_v30 }
 0x1bf   :  { %765 = vrot.lane.b32.xlu0 %v3003_v7, %s2148_s4  ;;  %v949_v24 = vmul.f32 %v3086_v23, %v931_v49  ;;  %v950_v63 = vmul.f32 %v3089_v52, %v927_v60  ;;  %v3133_v49 = vmul.f32 %v2639_v14, %v2389_v34 }
 0x1c0   :  { %v851_v0 = vadd.f32 %v843_v61, %v798_v48  ;;  %v852_v53 = vadd.f32 %v844_v43, %v799_v51  ;;  %v3103_v1 = vpop.permute.xlu1 %525  ;;  %v3105_v16 = vpop.permute.xlu0 %863  ;;  %v3121_v61 = vmul.f32 %v2627_v46, %v2518_v29  ;;  %v978_v12 = vmul.f32 %v3108_v36, %v2322_v58 }
 0x1c1   :  { %4596 = vst [vmem:[#allocation68_spill] sm:$0xff] %v3105_v16  ;;  %v979_v60 = vmul.f32 %v3111_v47, %v2334_v5  ;;  %4599 = vst [vmem:[#allocation71_spill] sm:$0xff] %v3133_v49  ;;  %v3149_v5 = vmul.f32 %v2639_v14, %v2522_v31  ;;  %v4618_v16 = vld [vmem:[#allocation33_spill] sm:$0xff] }
 0x1c2   :  { %v904_v11 = vadd.f32 %v896_v21, %v851_v0  ;;  %v905_v13 = vadd.f32 %v897_v10, %v852_v53  ;;  %812 = vrot.lane.b32.xlu1 %v2999_v27, %s2149_s22  ;;  %4597 = vst [vmem:[#allocation69_spill] sm:$0xff] %v3121_v61 }
 0x1c3   :  { %818 = vrot.lane.b32.xlu0 %v3003_v7, %s2149_s22  ;;  %4601 = vst [vmem:[#allocation73_spill] sm:$0xff] %v3149_v5 }
 0x1c4   :  { %v957_v43 = vadd.f32 %v949_v24, %v904_v11  ;;  %v958_v38 = vadd.f32 %v950_v63, %v905_v13  ;;  %v3123_v48 = vpop.permute.xlu1 %620  ;;  %v3125_v51 = vpop.permute.xlu0 %916  ;;  %v3185_v63 = vmul.f32 %v2658_v59, %v2338_v6 }
 0x1c5   :  { %4598 = vst [vmem:[#allocation70_spill] sm:$0xff] %v3125_v51 }
 0x1c6   :  { %1151 = vrot.lane.b32.xlu1 %v3121_v61, %s2146_s2  ;;  %v3137_v29 = vadd.f32 %v978_v12, %v957_v43  ;;  %v3139_v46 = vadd.f32 %v979_v60, %v958_v38  ;;  %4603 = vst [vmem:[#allocation75_spill] sm:$0xff] %v3185_v63 }
 0x1c7   :  { %1145 = vrot.lane.b32.xlu0 %v3133_v49, %s2146_s2 }
 0x1c8   :  { %v3143_v11 = vpop.permute.xlu1 %673  ;;  %v3145_v58 = vpop.permute.xlu0 %998 }
 0x1c9   :  { %4600 = vst [vmem:[#allocation72_spill] sm:$0xff] %v3145_v58 }
 0x1ca   :  { %1327 = vrot.lane.b32.xlu1 %v2545_v50, %s2149_s22 }
 0x1cb   :  { %1153 = vrot.lane.b32.xlu0 %v3149_v5, %s2146_s2 }
 0x1cc   :  { %v3155_v34 = vpop.permute.xlu1 %755  ;;  %v3157_v21 = vpop.permute.xlu0 %1051 }
 0x1cd   :  { %4602 = vst [vmem:[#allocation74_spill] sm:$0xff] %v3157_v21  ;;  %v4607_v21 = vld [vmem:[#allocation19_spill] sm:$0xff] }
 0x1ce   :  { %1335 = vrot.lane.b32.xlu1 %v2588_v57, %s2149_s22  ;;  %v3203_v57 = vmul.f32 %v2658_v59, %v2363_v20 }
 0x1cf   :  { %1329 = vrot.lane.b32.xlu0 %v2667_v44, %s2149_s22 }
 0x1d0   :  { %v3163_v10 = vpop.permute.xlu1 %808  ;;  %v3165_v31 = vpop.permute.xlu0 %1141  ;;  %4604 = vst [vmem:[#allocation76_spill] sm:$0xff] %v3203_v57 }
 0x1d2   :  { %1196 = vrot.lane.b32.xlu1 %v2841_v35, %s2147_s3 }
 0x1d3   :  { %1337 = vrot.lane.b32.xlu0 %v2741_v33, %s2149_s22 }
 0x1d4   :  { %v350_v14 = vpop.permute.xlu1 %349  ;;  %v3171_v0 = vpop.permute.xlu0 %1194 }
 0x1d5   :  { %v358_v53 = vsel %vm355_vm12, %v2995_v8, %v350_v14  ;;  %v362_v24 = vsel %vm355_vm12, %v350_v14, %v2995_v8 }
 0x1d6   :  { %1204 = vrot.lane.b32.xlu1 %v3121_v61, %s2147_s3  ;;  %v380_v8 = vmul.f32 %v2859_v56, %v362_v24  ;;  %v381_v60 = vmul.f32 %v2862_v15, %v358_v53  ;;  %v455_v24 = vmul.f32 %v2897_v9, %v2615_v42 }
 0x1d7   :  { %1198 = vrot.lane.b32.xlu0 %v3133_v49, %s2147_s3 }
 0x1d8   :  { %v397_v13 = vpop.permute.xlu1 %396  ;;  %v3187_v43 = vpop.permute.xlu0 %1276 }
 0x1d9   :  { %v403_v38 = vsel %vm400_vm13, %v3030_v32, %v397_v13  ;;  %v407_v12 = vsel %vm400_vm13, %v397_v13, %v3030_v32  ;;  %v456_v13 = vmul.f32 %v2900_v54, %v2686_v18 }
 0x1da   :  { %v426_v14 = vmul.f32 %v2849_v45, %v407_v12  ;;  %v427_v6 = vmul.f32 %v2852_v3, %v403_v38  ;;  %1421 = vrot.lane.b32.xlu1 %v3185_v63, %s2146_s2  ;;  %v4606_v12 = vld [vmem:[#allocation9_spill] sm:$0xff]  ;;  %v4625_v3 = vld [vmem:[#allocation28_spill] sm:$0xff] }
 0x1db   :  { %1206 = vrot.lane.b32.xlu0 %v3149_v5, %s2147_s3  ;;  %v3215_v58 = vmul.f32 %v4607_v21, %v4606_v12 }
 0x1dc   :  { %v434_v50 = vadd.f32 %v426_v14, %v380_v8  ;;  %v435_v32 = vadd.f32 %v427_v6, %v381_v60  ;;  %v480_v53 = vpop.permute.xlu1 %479  ;;  %v3211_v38 = vpop.permute.xlu0 %871  ;;  %v2003_v14 = vld [vmem:[%s4395_s5 + $0x15] ss:$8 sm:$0x3] }
 0x1dd   :  { %4605 = vst [vmem:[#allocation77_spill] sm:$0xff] %v3211_v38  ;;  %4608 = vst [vmem:[#allocation9_spill] sm:$0xff] %v3215_v58  ;;  %v486_v20 = vsel %vm483_vm14, %v3062_v19, %v480_v53  ;;  %v490_v59 = vsel %vm483_vm14, %v480_v53, %v3062_v19  ;;  %v2004_v53 = vld [vmem:[%s4395_s5 + $0x16] ss:$8 sm:$0x3]  ;;  %v4619_v38 = vld [vmem:[#allocation26_spill] sm:$0xff] }
 0x1de   :  { %v463_v8 = vadd.f32 %v455_v24, %v434_v50  ;;  %v464_v42 = vadd.f32 %v456_v13, %v435_v32  ;;  %v509_v60 = vmul.f32 %v2909_v4, %v486_v20  ;;  %v510_v18 = vmul.f32 %v2912_v37, %v490_v59  ;;  %1429 = vrot.lane.b32.xlu1 %v3203_v57, %s2146_s2  ;;  %v2007_v50 = vld [vmem:[%s4395_s5 + $0x21] ss:$8 sm:$0x3]  ;;  %v4612_v59 = vld [vmem:[#allocation57_spill] sm:$0xff] }
 0x1df   :  { %1423 = vrot.lane.b32.xlu0 %v3215_v58, %s2146_s2  ;;  %v4610_v32 = vld [vmem:[#allocation10_spill] sm:$0xff]  ;;  %v2005_v37 = vld [vmem:[%s4395_s5 + $0x17] ss:$8 sm:$0x3] }
 0x1e0   :  { %v517_v6 = vadd.f32 %v509_v60, %v463_v8  ;;  %v518_v12 = vadd.f32 %v510_v18, %v464_v42  ;;  %v534_v51 = vpop.permute.xlu1 %533  ;;  %v3232_v19 = vpop.permute.xlu0 %924  ;;  %v3239_v24 = vmul.f32 %v4607_v21, %v4610_v32  ;;  %v4613_v42 = vld [vmem:[#allocation58_spill] sm:$0xff]  ;;  %v3255_v21 = vrot.slane %v2003_v14, %v2290_v28 }
 0x1e1   :  { %4609 = vst [vmem:[#allocation19_spill] sm:$0xff] %v3232_v19  ;;  %v540_v13 = vsel %vm537_vm15, %v3103_v1, %v534_v51  ;;  %v544_v20 = vsel %vm537_vm15, %v534_v51, %v3103_v1  ;;  %v3260_v18 = vrot.slane %v2007_v50, %v2290_v28  ;;  %v3263_v32 = vrot.slane %v2007_v50, %v2296_v30 }
 0x1e2   :  { %4611 = vst [vmem:[#allocation10_spill] sm:$0xff] %v3239_v24  ;;  %v563_v8 = vmul.f32 %v4612_v59, %v540_v13  ;;  %v564_v60 = vmul.f32 %v4613_v42, %v544_v20  ;;  %1474 = vrot.lane.b32.xlu1 %v3185_v63, %s2147_s3  ;;  %4614 = vst [vmem:[#allocation78_spill] sm:$0xff] %v3255_v21  ;;  %v3266_v1 = vrot.slane %v2003_v14, %v2296_v30 }
 0x1e3   :  { %1431 = vrot.lane.b32.xlu0 %v3239_v24, %s2146_s2  ;;  %4615 = vst [vmem:[#allocation79_spill] sm:$0xff] %v3260_v18  ;;  %4616 = vst [vmem:[#allocation80_spill] sm:$0xff] %v3263_v32  ;;  %v3269_v51 = vrot.slane %v2004_v53, %v2290_v28  ;;  %v1009_v42 = vsel %vm483_vm14, %v4619_v38, %v4618_v16  ;;  %v1013_v50 = vsel %vm483_vm14, %v4618_v16, %v4619_v38  ;;  %v4621_v16 = vld [vmem:[#allocation18_spill] sm:$0xff] }
 0x1e4   :  { %4617 = vst [vmem:[#allocation81_spill] sm:$0xff] %v3266_v1  ;;  %v571_v13 = vadd.f32 %v563_v8, %v517_v6  ;;  %v572_v20 = vadd.f32 %v564_v60, %v518_v12  ;;  %v629_v19 = vpop.permute.xlu1 %628  ;;  %v3285_v12 = vpop.permute.xlu0 %1006  ;;  %v3288_v8 = vrot.slane %v2004_v53, %v2296_v30  ;;  %v739_v38 = vmul.f32 %v2990_v39, %v4621_v16 }
 0x1e5   :  { %v634_v14 = vsel %vm355_vm12, %v3123_v48, %v629_v19  ;;  %v638_v6 = vsel %vm355_vm12, %v629_v19, %v3123_v48  ;;  %4620 = vst [vmem:[#allocation33_spill] sm:$0xff] %v3285_v12  ;;  %v4622_v48 = vld [vmem:[#allocation30_spill] sm:$0xff]  ;;  %v3305_v53 = vmul.f32 %v3260_v18, %v2667_v44  ;;  %v1031_v12 = vmul.f32 %v3255_v21, %v1009_v42 }
 0x1e6   :  { %v657_v60 = vmul.f32 %v2947_v17, %v638_v6  ;;  %v658_v59 = vmul.f32 %v2950_v55, %v634_v14  ;;  %1482 = vrot.lane.b32.xlu1 %v3203_v57, %s2147_s3  ;;  %v740_v19 = vmul.f32 %v2993_v25, %v4622_v48  ;;  %v3309_v14 = vmul.f32 %v3263_v32, %v2741_v33  ;;  %v4623_v6 = vld [vmem:[#allocation6_spill] sm:$0xff] }
 0x1e7   :  { %1476 = vrot.lane.b32.xlu0 %v3215_v58, %s2147_s3  ;;  %v3313_v16 = vmul.f32 %v3108_v36, %v4623_v6  ;;  %v1032_v55 = vmul.f32 %v3266_v1, %v1013_v50  ;;  %v2006_v48 = vld [vmem:[%s4395_s5 + $0x20] ss:$8 sm:$0x3]  ;;  %v3340_v50 = vrot.slane %v2005_v37, %v2296_v30 }
 0x1e8   :  { %v665_v17 = vadd.f32 %v657_v60, %v571_v13  ;;  %v666_v4 = vadd.f32 %v658_v59, %v572_v20  ;;  %v682_v44 = vpop.permute.xlu1 %681  ;;  %v4624_v18 = vld [vmem:[#allocation34_spill] sm:$0xff]  ;;  %v3334_v59 = vpop.permute.xlu0 %1059  ;;  %v3337_v20 = vrot.slane %v2005_v37, %v2290_v28  ;;  %v4632_v1 = vld [vmem:[#allocation35_spill] sm:$0xff] }
 0x1e9   :  { %v1062_v33 = vsel %vm537_vm15, %v4625_v3, %v4624_v18  ;;  %v1066_v6 = vsel %vm537_vm15, %v4624_v18, %v4625_v3  ;;  %v687_v42 = vsel %vm400_vm13, %v3143_v11, %v682_v44  ;;  %v691_v13 = vsel %vm400_vm13, %v682_v44, %v3143_v11  ;;  %4626 = vst [vmem:[#allocation26_spill] sm:$0xff] %v3334_v59 }
 0x1ea   :  { %4627 = vst [vmem:[#allocation18_spill] sm:$0xff] %v3337_v20  ;;  %4628 = vst [vmem:[#allocation30_spill] sm:$0xff] %v3340_v50  ;;  %v710_v60 = vmul.f32 %v2975_v26, %v691_v13  ;;  %v711_v3 = vmul.f32 %v2978_v62, %v687_v42  ;;  %1278 = vrot.lane.b32.xlu1 %v2841_v35, %s2148_s4  ;;  %v3347_v18 = vrot.slane %v2006_v48, %v2290_v28  ;;  %v4631_v26 = vld [vmem:[#allocation46_spill] sm:$0xff] }
 0x1eb   :  { %v3350_v11 = vrot.slane %v2006_v48, %v2296_v30  ;;  %1484 = vrot.lane.b32.xlu0 %v3239_v24, %s2147_s3  ;;  %v1039_v44 = vadd.f32 %v1031_v12, %v3137_v29  ;;  %v1040_v37 = vadd.f32 %v1032_v55, %v3139_v46  ;;  %v1084_v13 = vmul.f32 %v3269_v51, %v1062_v33  ;;  %v4633_v33 = vld [vmem:[#allocation65_spill] sm:$0xff] }
 0x1ec   :  { %4629 = vst [vmem:[#allocation6_spill] sm:$0xff] %v3347_v18  ;;  %v1085_v42 = vmul.f32 %v3288_v8, %v1066_v6  ;;  %v718_v32 = vadd.f32 %v710_v60, %v665_v17  ;;  %v719_v59 = vadd.f32 %v711_v3, %v666_v4  ;;  %v764_v62 = vpop.permute.xlu1 %763  ;;  %v875_v48 = vsel %vm355_vm12, %v4632_v1, %v4631_v26  ;;  %v1150_v4 = vpop.permute.xlu0 %1149  ;;  %v4634_v3 = vld [vmem:[#allocation47_spill] sm:$0xff] }
 0x1ed   :  { %4630 = vst [vmem:[#allocation34_spill] sm:$0xff] %v3350_v11  ;;  %v879_v21 = vsel %vm355_vm12, %v4631_v26, %v4632_v1  ;;  %v769_v55 = vsel %vm483_vm14, %v3155_v34, %v764_v62  ;;  %v773_v17 = vsel %vm483_vm14, %v764_v62, %v3155_v34  ;;  %v1092_v60 = vadd.f32 %v1084_v13, %v1039_v44  ;;  %v4635_v44 = vld [vmem:[#allocation36_spill] sm:$0xff] }
 0x1ee   :  { %v747_v29 = vadd.f32 %v739_v38, %v718_v32  ;;  %v748_v46 = vadd.f32 %v740_v19, %v719_v59  ;;  %v792_v12 = vmul.f32 %v3012_v41, %v769_v55  ;;  %v793_v6 = vmul.f32 %v4633_v33, %v773_v17  ;;  %1286 = vrot.lane.b32.xlu1 %v3121_v61, %s2148_s4  ;;  %v2008_v17 = vld [vmem:[%s4395_s5 + $0x22] ss:$8 sm:$0x3] }
 0x1ef   :  { %v1093_v26 = vadd.f32 %v1085_v42, %v1040_v37  ;;  %v1156_v1 = vsel %vm355_vm12, %v3165_v31, %v1150_v4  ;;  %v1160_v62 = vsel %vm355_vm12, %v1150_v4, %v3165_v31  ;;  %1280 = vrot.lane.b32.xlu0 %v3133_v49, %s2148_s4  ;;  %v928_v37 = vsel %vm400_vm13, %v4635_v44, %v4634_v3 }
 0x1f0   :  { %v800_v34 = vadd.f32 %v792_v12, %v747_v29  ;;  %v801_v32 = vadd.f32 %v793_v6, %v748_v46  ;;  %v1178_v38 = vmul.f32 %v3337_v20, %v1160_v62  ;;  %v1179_v19 = vmul.f32 %v3340_v50, %v1156_v1  ;;  %v817_v59 = vpop.permute.xlu1 %816  ;;  %v1203_v55 = vpop.permute.xlu0 %1202  ;;  %v4636_v46 = vld [vmem:[#allocation66_spill] sm:$0xff]  ;;  %v4637_v6 = vld [vmem:[#allocation67_spill] sm:$0xff] }
 0x1f1   :  { %v932_v31 = vsel %vm400_vm13, %v4634_v3, %v4635_v44  ;;  %v822_v13 = vsel %vm537_vm15, %v3163_v10, %v817_v59  ;;  %v826_v42 = vsel %vm537_vm15, %v817_v59, %v3163_v10  ;;  %v898_v62 = vmul.f32 %v3054_v2, %v879_v21 }
 0x1f2   :  { %v1186_v4 = vadd.f32 %v1178_v38, %v1092_v60  ;;  %v1187_v29 = vadd.f32 %v1179_v19, %v1093_v26  ;;  %v845_v12 = vmul.f32 %v4636_v46, %v822_v13  ;;  %v846_v1 = vmul.f32 %v4637_v6, %v826_v42  ;;  %1331 = vrot.lane.b32.xlu1 %v2841_v35, %s2149_s22  ;;  %v4657_v35 = vld [vmem:[#allocation43_spill] sm:$0xff] }
 0x1f3   :  { %v899_v3 = vmul.f32 %v3057_v22, %v875_v48  ;;  %v1209_v10 = vsel %vm400_vm13, %v3171_v0, %v1203_v55  ;;  %v1213_v60 = vsel %vm400_vm13, %v1203_v55, %v3171_v0  ;;  %1288 = vrot.lane.b32.xlu0 %v3149_v5, %s2148_s4  ;;  %v951_v48 = vmul.f32 %v3086_v23, %v932_v31  ;;  %v4639_v0 = vld [vmem:[#allocation7_spill] sm:$0xff] }
 0x1f4   :  { %v853_v26 = vadd.f32 %v845_v12, %v800_v34  ;;  %v854_v38 = vadd.f32 %v846_v1, %v801_v32  ;;  %v1231_v19 = vmul.f32 %v3347_v18, %v1213_v60  ;;  %v1232_v59 = vmul.f32 %v3350_v11, %v1209_v10  ;;  %v3419_v21 = vpop.permute.xlu1 %337  ;;  %v1285_v42 = vpop.permute.xlu0 %1284  ;;  %v2122_v34 = vld [vmem:[%s4396_s10 + $0x78] sm:$0xff]  }
 0x1f5   :  { %v952_v44 = vmul.f32 %v3089_v52, %v928_v37  ;;  %v3424_v13 = vrot.slane %v2008_v17, %v2290_v28  ;;  %v981_v55 = vmul.f32 %v3111_v47, %v4639_v0  ;;  %v3434_v37 = vrot.slane %v2008_v17, %v2296_v30  ;;  %2052 = vmatprep.subr.bf16.mxu1 %v2122_v34  ;;  %v2125_v0 = vld [vmem:[%s4396_s10 + $0x30] sm:$0xff]   ;;  %v4643_v34 = vld [vmem:[#allocation13_spill] sm:$0xff] }
 0x1f6   :  { %v906_v32 = vadd.f32 %v898_v62, %v853_v26  ;;  %v907_v12 = vadd.f32 %v899_v3, %v854_v38  ;;  %v1239_v1 = vadd.f32 %v1231_v19, %v1186_v4  ;;  %v1240_v10 = vadd.f32 %v1232_v59, %v1187_v29  ;;  %1339 = vrot.lane.b32.xlu1 %v3121_v61, %s2149_s22  ;;  %v2124_v59 = vld [vmem:[%s4396_s10 + $0x70] sm:$0xff]   ;;  %v4671_v18 = vld [vmem:[#allocation29_spill] sm:$0xff] }
 0x1f7   :  { %4638 = vst [vmem:[#allocation28_spill] sm:$0xff] %v3424_v13  ;;  %4640 = vst [vmem:[#allocation46_spill] sm:$0xff] %v3434_v37  ;;  %v1291_v31 = vsel %vm483_vm14, %v3187_v43, %v1285_v42  ;;  %v1295_v60 = vsel %vm483_vm14, %v1285_v42, %v3187_v43  ;;  %1333 = vrot.lane.b32.xlu0 %v3133_v49, %s2149_s22  ;;  %v2123_v43 = vld [vmem:[%s4396_s10 + $0x38] sm:$0xff]   ;;  %v3592_v30 = vmul.f32 %v2990_v39, %v4657_v35 }
 0x1f8   :  { %v959_v4 = vadd.f32 %v951_v48, %v906_v32  ;;  %v960_v29 = vadd.f32 %v952_v44, %v907_v12  ;;  %v1268_v62 = vadd.f32 %v3305_v53, %v1239_v1  ;;  %v1269_v3 = vadd.f32 %v3309_v14, %v1240_v10  ;;  %v3446_v17 = vpop.permute.xlu1 %384  ;;  %v3450_v19 = vpop.permute.xlu0 %343  ;;  %2053 = vmatpush3.bf16.msra.mxu1 %v2123_v43  ;;  %v4644_v32 = vld [vmem:[#allocation20_spill] sm:$0xff]  ;;  %v4656_v49 = vld [vmem:[#allocation53_spill] sm:$0xff] }
 0x1f9   :  { %v1313_v26 = vmul.f32 %v3424_v13, %v1291_v31  ;;  %v1314_v38 = vmul.f32 %v3434_v37, %v1295_v60  ;;  %2054 = vmatprep.subr.bf16.mxu1 %v2124_v59  ;;  %v3487_v12 = vmul.f32 %v4644_v32, %v4643_v34  ;;  %v2127_v31 = vld [vmem:[%s4396_s10 + $0x28] sm:$0xff]   ;;  %v2128_v60 = vld [vmem:[%s4396_s10 + $0x60] sm:$0xff]   ;;  %v458_v61 = vmul.f32 %v2900_v54, %v4656_v49  ;;  %v4661_v49 = vld [vmem:[#allocation4_spill] sm:$0xff] }
 0x1fa   :  { %1556 = vrot.lane.b32.xlu1 %v3185_v63, %s2148_s4  ;;  %v3461_v53 = vadd.f32 %v3313_v16, %v959_v4  ;;  %v3463_v14 = vadd.f32 %v981_v55, %v960_v29  ;;  %v2126_v16 = vld [vmem:[%s4396_s10 + $0x68] sm:$0xff]   ;;  %v4650_v34 = vld [vmem:[#allocation14_spill] sm:$0xff] }
 0x1fb   :  { %v3465_v48 = vadd.f32 %v1313_v26, %v1268_v62  ;;  %v3467_v44 = vadd.f32 %v1314_v38, %v1269_v3  ;;  %1341 = vrot.lane.b32.xlu0 %v3149_v5, %s2149_s22  ;;  %v4645_v4 = vld [vmem:[#allocation15_spill] sm:$0xff]  ;;  %v4647_v3 = vld [vmem:[#allocation12_spill] sm:$0xff]  ;;  %v4648_v26 = vld [vmem:[#allocation21_spill] sm:$0xff] }
 0x1fc   :  { %v3471_v42 = vpop.permute.xlu1 %467  ;;  %v3479_v55 = vpop.permute.xlu0 %390  ;;  %2055 = vmatpush3.bf16.msra.mxu1 %v2125_v0  ;;  %v3505_v29 = vmul.f32 %v4644_v32, %v4645_v4  ;;  %v3511_v38 = vmul.f32 %v4648_v26, %v4647_v3  ;;  %v2129_v0 = vld [vmem:[%s4396_s10 + $0x20] sm:$0xff]   ;;  %v3529_v32 = vmul.f32 %v4648_v26, %v4650_v34  ;;  %v2131_v3 = vld [vmem:[%s4396_s10 + $0x18] sm:$0xff]   ;;  %v2132_v26 = vld [vmem:[%s4396_s10 + $0x50] sm:$0xff]  }
 0x1fd   :  { %4641 = vst [vmem:[#allocation35_spill] sm:$0xff] %v3465_v48  ;;  %4642 = vst [vmem:[#allocation65_spill] sm:$0xff] %v3467_v44  ;;  %2056 = vmatprep.subr.bf16.mxu1 %v2126_v16  ;;  %v2130_v16 = vld [vmem:[%s4396_s10 + $0x58] sm:$0xff]   ;;  %v2134_v34 = vld [vmem:[%s4396_s10 + $0x48] sm:$0xff]  }
 0x1fe   :  { %1564 = vrot.lane.b32.xlu1 %v3203_v57, %s2148_s4  ;;  %4646 = vst [vmem:[#allocation47_spill] sm:$0xff] %v3505_v29  ;;  %4649 = vst [vmem:[#allocation36_spill] sm:$0xff] %v3511_v38 }
 0x1ff   :  { %1558 = vrot.lane.b32.xlu0 %v3215_v58, %s2148_s4  ;;  %4651 = vst [vmem:[#allocation66_spill] sm:$0xff] %v3529_v32 }
 0x200   :  { %v3489_v1 = vpop.permute.xlu1 %521  ;;  %v3491_v10 = vpop.permute.xlu0 %473  ;;  %2057 = vmatpush3.bf16.msra.mxu1 %v2127_v31 }
 0x201   :  { %2058 = vmatprep.subr.bf16.mxu1 %v2128_v60 }
 0x202   :  { %1425 = vrot.lane.b32.xlu1 %v3487_v12, %s2146_s2 }
 0x203   :  { %1566 = vrot.lane.b32.xlu0 %v3239_v24, %s2148_s4 }
 0x204   :  { %v3507_v62 = vpop.permute.xlu1 %616  ;;  %v3513_v43 = vpop.permute.xlu0 %527  ;;  %2059 = vmatpush3.bf16.msra.mxu1 %v2129_v0  ;;  %v2133_v0 = vld [vmem:[%s4396_s10 + $0x10] sm:$0xff]  }
 0x205   :  { %2060 = vmatprep.subr.bf16.mxu1 %v2130_v16 }
 0x206   :  { %1433 = vrot.lane.b32.xlu1 %v3505_v29, %s2146_s2 }
 0x207   :  { %1427 = vrot.lane.b32.xlu0 %v3511_v38, %s2146_s2 }
 0x208   :  { %v3519_v59 = vpop.permute.xlu1 %669  ;;  %v3531_v31 = vpop.permute.xlu0 %622  ;;  %2061 = vmatpush3.bf16.msra.mxu1 %v2131_v3  ;;  %v2135_v3 = vld [vmem:[%s4396_s10 + $0x8] sm:$0xff]  }
 0x209   :  { %2062 = vmatprep.subr.bf16.mxu1 %v2132_v26  ;;  %v2136_v26 = vld [vmem:[%s4396_s10 + $0x40] sm:$0xff]  }
 0x20a   :  { %1609 = vrot.lane.b32.xlu1 %v3185_v63, %s2149_s22  ;;  %v2137_v63 = vld [vmem:[%s4396_s10] sm:$0xff]  }
 0x20b   :  { %1435 = vrot.lane.b32.xlu0 %v3529_v32, %s2146_s2 }
 0x20c   :  { %v3537_v60 = vpop.permute.xlu1 %751  ;;  %v3539_v4 = vpop.permute.xlu0 %675  ;;  %2063 = vmatpush3.bf16.msra.mxu1 %v2133_v0  ;;  %v4653_v0 = vld [vmem:[#allocation37_spill] sm:$0xff] }
 0x20d   :  { %2064 = vmatprep.subr.bf16.mxu1 %v2134_v34  ;;  %v451_v13 = vmul.f32 %v2897_v9, %v4653_v0  ;;  %v3596_v0 = vmul.f32 %v2993_v25, %v2999_v27  ;;  %v3612_v27 = vmul.f32 %v2993_v25, %v3003_v7  ;;  %v4663_v7 = vld [vmem:[#allocation5_spill] sm:$0xff] }
 0x20e   :  { %1617 = vrot.lane.b32.xlu1 %v3203_v57, %s2149_s22  ;;  %v4655_v57 = vld [vmem:[#allocation39_spill] sm:$0xff] }
 0x20f   :  { %1611 = vrot.lane.b32.xlu0 %v3215_v58, %s2149_s22  ;;  %v457_v34 = vmul.f32 %v2897_v9, %v4655_v57  ;;  %v4659_v9 = vld [vmem:[#allocation27_spill] sm:$0xff] }
 0x210   :  { %v3554_v16 = vpop.permute.xlu1 %804  ;;  %v3559_v44 = vpop.permute.xlu0 %757  ;;  %2065 = vmatpush3.bf16.msra.mxu1 %v2135_v3  ;;  %v4660_v3 = vld [vmem:[#allocation22_spill] sm:$0xff] }
 0x211   :  { %2066 = vmatprep.subr.bf16.mxu1 %v2136_v26  ;;  %v873_v28 = vsel %vm355_vm12, %v4660_v3, %v4659_v9  ;;  %v877_v35 = vsel %vm355_vm12, %v4659_v9, %v4660_v3  ;;  %v3636_v3 = vmul.f32 %v3111_v47, %v4663_v7 }
 0x212   :  { %1478 = vrot.lane.b32.xlu1 %v3487_v12, %s2147_s3 }
 0x213   :  { %1619 = vrot.lane.b32.xlu0 %v3239_v24, %s2149_s22  ;;  %v4654_v24 = vld [vmem:[#allocation52_spill] sm:$0xff]  ;;  %4664 = vst [vmem:[#allocation13_spill] sm:$0xff] %v3636_v3 }
 0x214   :  { %v3568_v48 = vpop.permute.xlu1 %1143  ;;  %v3573_v37 = vpop.permute.xlu0 %810  ;;  %v452_v58 = vmul.f32 %v2900_v54, %v4654_v24  ;;  %v4658_v24 = vld [vmem:[#allocation45_spill] sm:$0xff]  ;;  %2067 = vmatpush3.bf16.msra.mxu1 %v2137_v63 }
 0x215   :  { %4652 = vst [vmem:[#allocation67_spill] sm:$0xff] %v3568_v48  ;;  %v3600_v57 = vmul.f32 %v2990_v39, %v4658_v24  ;;  %v3616_v39 = vmul.f32 %v3108_v36, %v4661_v49  ;;  %v4665_v49 = vld [vmem:[#allocation8_spill] sm:$0xff] }
 0x216   :  { %1486 = vrot.lane.b32.xlu1 %v3505_v29, %s2147_s3  ;;  %v4677_v48 = vld [vmem:[#allocation56_spill] sm:$0xff] }
 0x217   :  { %1480 = vrot.lane.b32.xlu0 %v3511_v38, %s2147_s3  ;;  %4662 = vst [vmem:[#allocation7_spill] sm:$0xff] %v3616_v39  ;;  %v4672_v39 = vld [vmem:[#allocation23_spill] sm:$0xff] }
 0x218   :  { %v346_v5 = vpop.permute.xlu1 %345  ;;  %v352_v54 = vpop.permute.xlu0 %351  ;;  %v926_v7 = vsel %vm400_vm13, %v4672_v39, %v4671_v18 }
 0x219   :  { %v356_v26 = vsel %vm355_vm12, %v3419_v21, %v346_v5  ;;  %v360_v24 = vsel %vm355_vm12, %v346_v5, %v3419_v21  ;;  %v359_v9 = vsel %vm355_vm12, %v3450_v19, %v352_v54  ;;  %v363_v25 = vsel %vm355_vm12, %v352_v54, %v3450_v19  ;;  %v4667_v21 = vld [vmem:[#allocation11_spill] sm:$0xff] }
 0x21a   :  { %1560 = vrot.lane.b32.xlu1 %v3487_v12, %s2148_s4  ;;  %v3640_v5 = vmul.f32 %v3108_v36, %v4665_v49  ;;  %v3644_v11 = vmul.f32 %v3111_v47, %v4667_v21  ;;  %v3647_v19 = vmul.f32 %v3054_v2, %v877_v35  ;;  %v3650_v54 = vmul.f32 %v3057_v22, %v873_v28 }
 0x21b   :  { %1488 = vrot.lane.b32.xlu0 %v3529_v32, %s2147_s3  ;;  %v930_v36 = vsel %vm400_vm13, %v4671_v18, %v4672_v39  ;;  %v376_v47 = vmul.f32 %v2859_v56, %v360_v24  ;;  %v377_v63 = vmul.f32 %v2862_v15, %v356_v26  ;;  %v382_v26 = vmul.f32 %v2859_v56, %v363_v25 }
 0x21c   :  { %4666 = vst [vmem:[#allocation20_spill] sm:$0xff] %v3640_v5  ;;  %4668 = vst [vmem:[#allocation15_spill] sm:$0xff] %v3644_v11  ;;  %v393_v49 = vpop.permute.xlu1 %392  ;;  %v399_v21 = vpop.permute.xlu0 %398  ;;  %v4673_v5 = vld [vmem:[#allocation50_spill] sm:$0xff] }
 0x21d   :  { %4669 = vst [vmem:[#allocation12_spill] sm:$0xff] %v3647_v19  ;;  %4670 = vst [vmem:[#allocation21_spill] sm:$0xff] %v3650_v54  ;;  %v401_v28 = vsel %vm400_vm13, %v3446_v17, %v393_v49  ;;  %v405_v35 = vsel %vm400_vm13, %v393_v49, %v3446_v17  ;;  %v404_v18 = vsel %vm400_vm13, %v3479_v55, %v399_v21  ;;  %v4676_v54 = vld [vmem:[#allocation55_spill] sm:$0xff] }
 0x21e   :  { %v422_v11 = vmul.f32 %v2849_v45, %v405_v35  ;;  %v423_v3 = vmul.f32 %v4673_v5, %v401_v28  ;;  %v408_v39 = vsel %vm400_vm13, %v399_v21, %v3479_v55  ;;  %1568 = vrot.lane.b32.xlu1 %v3505_v29, %s2148_s4  ;;  %v383_v17 = vmul.f32 %v2862_v15, %v359_v9  ;;  %v4674_v28 = vld [vmem:[#allocation48_spill] sm:$0xff]  ;;  %v4675_v35 = vld [vmem:[#allocation38_spill] sm:$0xff] }
 0x21f   :  { %v428_v24 = vmul.f32 %v2849_v45, %v408_v39  ;;  %v429_v49 = vmul.f32 %v4673_v5, %v404_v18  ;;  %1562 = vrot.lane.b32.xlu0 %v3511_v38, %s2148_s4  ;;  %v1010_v50 = vsel %vm483_vm14, %v4675_v35, %v4674_v28  ;;  %v1014_v55 = vsel %vm483_vm14, %v4674_v28, %v4675_v35  ;;  %v4679_v35 = vld [vmem:[#allocation58_spill] sm:$0xff] }
 0x220   :  { %v430_v56 = vadd.f32 %v422_v11, %v376_v47  ;;  %v431_v25 = vadd.f32 %v423_v3, %v377_v63  ;;  %v476_v15 = vpop.permute.xlu1 %475  ;;  %v482_v18 = vpop.permute.xlu0 %481 }
 0x221   :  { %v436_v9 = vadd.f32 %v428_v24, %v382_v26  ;;  %v437_v45 = vadd.f32 %v429_v49, %v383_v17  ;;  %v484_v5 = vsel %vm483_vm14, %v3471_v42, %v476_v15  ;;  %v488_v21 = vsel %vm483_vm14, %v476_v15, %v3471_v42  ;;  %v4678_v49 = vld [vmem:[#allocation57_spill] sm:$0xff] }
 0x222   :  { %v459_v39 = vadd.f32 %v451_v13, %v430_v56  ;;  %v460_v20 = vadd.f32 %v452_v58, %v431_v25  ;;  %v505_v19 = vmul.f32 %v4676_v54, %v484_v5  ;;  %v506_v28 = vmul.f32 %v4677_v48, %v488_v21  ;;  %1613 = vrot.lane.b32.xlu1 %v3487_v12, %s2149_s22  ;;  %v4681_v25 = vld [vmem:[#allocation81_spill] sm:$0xff] }
 0x223   :  { %v465_v11 = vadd.f32 %v457_v34, %v436_v9  ;;  %v466_v3 = vadd.f32 %v458_v61, %v437_v45  ;;  %v487_v47 = vsel %vm483_vm14, %v3491_v10, %v482_v18  ;;  %v491_v42 = vsel %vm483_vm14, %v482_v18, %v3491_v10  ;;  %1570 = vrot.lane.b32.xlu0 %v3529_v32, %s2148_s4 }
 0x224   :  { %v513_v58 = vadd.f32 %v505_v19, %v459_v39  ;;  %v514_v13 = vadd.f32 %v506_v28, %v460_v20  ;;  %v511_v63 = vmul.f32 %v4676_v54, %v487_v47  ;;  %v512_v26 = vmul.f32 %v4677_v48, %v491_v42  ;;  %v530_v17 = vpop.permute.xlu1 %529  ;;  %v536_v20 = vpop.permute.xlu0 %535  ;;  %v4683_v39 = vld [vmem:[#allocation40_spill] sm:$0xff] }
 0x225   :  { %v3713_v61 = vmul.f32 %v3086_v23, %v930_v36  ;;  %v3716_v34 = vmul.f32 %v3089_v52, %v926_v7  ;;  %v538_v10 = vsel %vm537_vm15, %v3489_v1, %v530_v17  ;;  %v542_v19 = vsel %vm537_vm15, %v530_v17, %v3489_v1  ;;  %v4680_v7 = vld [vmem:[#allocation78_spill] sm:$0xff] }
 0x226   :  { %v519_v24 = vadd.f32 %v511_v63, %v465_v11  ;;  %v520_v54 = vadd.f32 %v512_v26, %v466_v3  ;;  %v559_v48 = vmul.f32 %v4678_v49, %v538_v10  ;;  %v560_v56 = vmul.f32 %v4679_v35, %v542_v19  ;;  %1621 = vrot.lane.b32.xlu1 %v3505_v29, %s2149_s22  ;;  %v4685_v26 = vld [vmem:[#allocation61_spill] sm:$0xff]  ;;  %v4687_v19 = vld [vmem:[#allocation68_spill] sm:$0xff] }
 0x227   :  { %v3729_v36 = vmul.f32 %v4680_v7, %v1010_v50  ;;  %v3732_v15 = vmul.f32 %v4681_v25, %v1014_v55  ;;  %v541_v1 = vsel %vm537_vm15, %v3513_v43, %v536_v20  ;;  %v545_v9 = vsel %vm537_vm15, %v536_v20, %v3513_v43  ;;  %1615 = vrot.lane.b32.xlu0 %v3511_v38, %s2149_s22  ;;  %v4682_v55 = vld [vmem:[#allocation51_spill] sm:$0xff]  ;;  %v4686_v10 = vld [vmem:[#allocation77_spill] sm:$0xff] }
 0x228   :  { %v567_v45 = vadd.f32 %v559_v48, %v513_v58  ;;  %v568_v5 = vadd.f32 %v560_v56, %v514_v13  ;;  %v565_v21 = vmul.f32 %v4678_v49, %v541_v1  ;;  %v566_v50 = vmul.f32 %v4679_v35, %v545_v9  ;;  %v625_v18 = vpop.permute.xlu1 %624  ;;  %v631_v47 = vpop.permute.xlu0 %630  ;;  %v4684_v13 = vld [vmem:[#allocation60_spill] sm:$0xff] }
 0x229   :  { %v1063_v28 = vsel %vm537_vm15, %v4683_v39, %v4682_v55  ;;  %v1067_v43 = vsel %vm537_vm15, %v4682_v55, %v4683_v39  ;;  %v632_v11 = vsel %vm355_vm12, %v3507_v62, %v625_v18  ;;  %v636_v3 = vsel %vm355_vm12, %v625_v18, %v3507_v62  ;;  %v4688_v55 = vld [vmem:[#allocation63_spill] sm:$0xff] }
 0x22a   :  { %v573_v42 = vadd.f32 %v565_v21, %v519_v24  ;;  %v574_v58 = vadd.f32 %v566_v50, %v520_v54  ;;  %v653_v63 = vmul.f32 %v4684_v13, %v636_v3  ;;  %v654_v17 = vmul.f32 %v4685_v26, %v632_v11  ;;  %v4689_v11 = vld [vmem:[#allocation64_spill] sm:$0xff] }
 0x22b   :  { %v876_v20 = vsel %vm355_vm12, %v4687_v19, %v4686_v10  ;;  %v880_v49 = vsel %vm355_vm12, %v4686_v10, %v4687_v19  ;;  %v635_v62 = vsel %vm355_vm12, %v3531_v31, %v631_v47  ;;  %v639_v24 = vsel %vm355_vm12, %v631_v47, %v3531_v31  ;;  %1623 = vrot.lane.b32.xlu0 %v3529_v32, %s2149_s22  ;;  %v4691_v10 = vld [vmem:[#allocation70_spill] sm:$0xff] }
 0x22c   :  { %v661_v54 = vadd.f32 %v653_v63, %v567_v45  ;;  %v662_v48 = vadd.f32 %v654_v17, %v568_v5  ;;  %v659_v35 = vmul.f32 %v4684_v13, %v639_v24  ;;  %v660_v56 = vmul.f32 %v4685_v26, %v635_v62  ;;  %v678_v1 = vpop.permute.xlu1 %677  ;;  %v4690_v17 = vld [vmem:[#allocation19_spill] sm:$0xff] }
 0x22d   :  { %v3779_v9 = vmul.f32 %v3269_v51, %v1063_v28  ;;  %v3782_v21 = vmul.f32 %v3288_v8, %v1067_v43  ;;  %v685_v31 = vsel %vm400_vm13, %v3519_v59, %v678_v1  ;;  %v689_v45 = vsel %vm400_vm13, %v678_v1, %v3519_v59  ;;  %v684_v5 = vpop.permute.xlu0 %683 }
 0x22e   :  { %v667_v50 = vadd.f32 %v659_v35, %v573_v42  ;;  %v668_v18 = vadd.f32 %v660_v56, %v574_v58  ;;  %v706_v39 = vmul.f32 %v4688_v55, %v689_v45  ;;  %v707_v3 = vmul.f32 %v4689_v11, %v685_v31 }
 0x22f   :  { %v900_v28 = vmul.f32 %v3054_v2, %v880_v49  ;;  %v901_v43 = vmul.f32 %v3057_v22, %v876_v20  ;;  %v688_v47 = vsel %vm400_vm13, %v3539_v4, %v684_v5  ;;  %v692_v13 = vsel %vm400_vm13, %v684_v5, %v3539_v4 }
 0x230   :  { %v714_v59 = vadd.f32 %v706_v39, %v661_v54  ;;  %v715_v63 = vadd.f32 %v707_v3, %v662_v48  ;;  %v712_v42 = vmul.f32 %v4688_v55, %v692_v13  ;;  %v713_v58 = vmul.f32 %v4689_v11, %v688_v47  ;;  %v760_v26 = vpop.permute.xlu1 %759 }
 0x231   :  { %v929_v2 = vsel %vm400_vm13, %v4691_v10, %v4690_v17  ;;  %v933_v22 = vsel %vm400_vm13, %v4690_v17, %v4691_v10  ;;  %v767_v4 = vsel %vm483_vm14, %v3537_v60, %v760_v26  ;;  %v771_v19 = vsel %vm483_vm14, %v760_v26, %v3537_v60  ;;  %v766_v20 = vpop.permute.xlu0 %765  ;;  %v4692_v17 = vld [vmem:[#allocation67_spill] sm:$0xff]  ;;  %v4694_v10 = vld [vmem:[#allocation21_spill] sm:$0xff] }
 0x232   :  { %v720_v49 = vadd.f32 %v712_v42, %v667_v50  ;;  %v721_v62 = vadd.f32 %v713_v58, %v668_v18  ;;  %v743_v24 = vadd.f32 %v3592_v30, %v714_v59  ;;  %v744_v54 = vadd.f32 %v3596_v0, %v715_v63 }
 0x233   :  { %v788_v48 = vmul.f32 %v3012_v41, %v767_v4  ;;  %v789_v35 = vmul.f32 %v4633_v33, %v771_v19  ;;  %v770_v56 = vsel %vm483_vm14, %v3559_v44, %v766_v20  ;;  %v774_v1 = vsel %vm483_vm14, %v766_v20, %v3559_v44 }
 0x234   :  { %v749_v60 = vadd.f32 %v3600_v57, %v720_v49  ;;  %v750_v31 = vadd.f32 %v3612_v27, %v721_v62  ;;  %v794_v30 = vmul.f32 %v3012_v41, %v770_v56  ;;  %v795_v0 = vmul.f32 %v4633_v33, %v774_v1  ;;  %v813_v45 = vpop.permute.xlu1 %812  ;;  %v4698_v56 = vld [vmem:[#allocation72_spill] sm:$0xff] }
 0x235   :  { %v796_v5 = vadd.f32 %v788_v48, %v743_v24  ;;  %v797_v50 = vadd.f32 %v789_v35, %v744_v54  ;;  %v820_v18 = vsel %vm537_vm15, %v3554_v16, %v813_v45  ;;  %v824_v55 = vsel %vm537_vm15, %v813_v45, %v3554_v16  ;;  %v819_v44 = vpop.permute.xlu0 %818  ;;  %v4697_v35 = vld [vmem:[#allocation33_spill] sm:$0xff]  ;;  %v4701_v45 = vld [vmem:[#allocation26_spill] sm:$0xff] }
 0x236   :  { %v802_v39 = vadd.f32 %v794_v30, %v749_v60  ;;  %v803_v57 = vadd.f32 %v795_v0, %v750_v31  ;;  %v841_v27 = vmul.f32 %v4636_v46, %v820_v18  ;;  %v842_v41 = vmul.f32 %v4637_v6, %v824_v55 }
 0x237   :  { %v823_v33 = vsel %vm537_vm15, %v3573_v37, %v819_v44  ;;  %v827_v11 = vsel %vm537_vm15, %v819_v44, %v3573_v37  ;;  %v1041_v3 = vadd.f32 %v3729_v36, %v3461_v53  ;;  %v1042_v16 = vadd.f32 %v3732_v15, %v3463_v14  ;;  %v4693_v36 = vld [vmem:[#allocation12_spill] sm:$0xff] }
 0x238   :  { %v849_v47 = vadd.f32 %v841_v27, %v796_v5  ;;  %v850_v13 = vadd.f32 %v842_v41, %v797_v50  ;;  %v847_v59 = vmul.f32 %v4636_v46, %v823_v33  ;;  %v848_v63 = vmul.f32 %v4637_v6, %v827_v11  ;;  %v1152_v42 = vpop.permute.xlu1 %1151  ;;  %v4702_v5 = vld [vmem:[#allocation74_spill] sm:$0xff]  ;;  %v4703_v27 = vld [vmem:[#allocation20_spill] sm:$0xff]  ;;  %v4704_v33 = vld [vmem:[#allocation15_spill] sm:$0xff] }
 0x239   :  { %v953_v58 = vmul.f32 %v3086_v23, %v933_v22  ;;  %v954_v26 = vmul.f32 %v3089_v52, %v929_v2  ;;  %v1157_v37 = vsel %vm355_vm12, %v4692_v17, %v1152_v42  ;;  %v1161_v53 = vsel %vm355_vm12, %v1152_v42, %v4692_v17  ;;  %v1146_v14 = vpop.permute.xlu0 %1145  ;;  %v4695_v52 = vld [vmem:[#allocation18_spill] sm:$0xff] }
 0x23a   :  { %v902_v15 = vadd.f32 %v4693_v36, %v849_v47  ;;  %v903_v46 = vadd.f32 %v4694_v10, %v850_v13  ;;  %v855_v4 = vadd.f32 %v847_v59, %v802_v39  ;;  %v856_v6 = vadd.f32 %v848_v63, %v803_v57  ;;  %v4696_v22 = vld [vmem:[#allocation30_spill] sm:$0xff] }
 0x23b   :  { %v1094_v19 = vadd.f32 %v3779_v9, %v1041_v3  ;;  %v1095_v23 = vadd.f32 %v3782_v21, %v1042_v16  ;;  %v1180_v2 = vmul.f32 %v4695_v52, %v1161_v53  ;;  %v1181_v20 = vmul.f32 %v4696_v22, %v1157_v37 }
 0x23c   :  { %v955_v49 = vadd.f32 %v3713_v61, %v902_v15  ;;  %v956_v62 = vadd.f32 %v3716_v34, %v903_v46  ;;  %v908_v24 = vadd.f32 %v900_v28, %v855_v4  ;;  %v909_v54 = vadd.f32 %v901_v43, %v856_v6  ;;  %v3866_v48 = vpop.permute.xlu1 %1327  ;;  %v4699_v61 = vld [vmem:[#allocation7_spill] sm:$0xff]  ;;  %v4700_v34 = vld [vmem:[#allocation13_spill] sm:$0xff]  ;;  %v4705_v6 = vld [vmem:[#allocation6_spill] sm:$0xff] }
 0x23d   :  { %v1011_v1 = vsel %vm483_vm14, %v4698_v56, %v4697_v35  ;;  %v1015_v9 = vsel %vm483_vm14, %v4697_v35, %v4698_v56  ;;  %v1188_v21 = vadd.f32 %v1180_v2, %v1094_v19  ;;  %v1189_v60 = vadd.f32 %v1181_v20, %v1095_v23  ;;  %v1154_v31 = vpop.permute.xlu0 %1153  ;;  %v4706_v23 = vld [vmem:[#allocation34_spill] sm:$0xff] }
 0x23e   :  { %v984_v30 = vadd.f32 %v4699_v61, %v955_v49  ;;  %v985_v28 = vadd.f32 %v4700_v34, %v956_v62  ;;  %v961_v43 = vadd.f32 %v953_v58, %v908_v24  ;;  %v962_v0 = vadd.f32 %v954_v26, %v909_v54 }
 0x23f   :  { %v1064_v50 = vsel %vm537_vm15, %v4702_v5, %v4701_v45  ;;  %v1068_v18 = vsel %vm537_vm15, %v4701_v45, %v4702_v5  ;;  %v1158_v55 = vsel %vm355_vm12, %v1146_v14, %v1154_v31  ;;  %v1162_v44 = vsel %vm355_vm12, %v1154_v31, %v1146_v14 }
 0x240   :  { %v1035_v39 = vmul.f32 %v4680_v7, %v1011_v1  ;;  %v1036_v57 = vmul.f32 %v4681_v25, %v1015_v9  ;;  %v990_v41 = vadd.f32 %v4703_v27, %v961_v43  ;;  %v991_v11 = vadd.f32 %v4704_v33, %v962_v0  ;;  %v3894_v3 = vpop.permute.xlu1 %1335  ;;  %v4707_v43 = vld [vmem:[#allocation31_spill] sm:$0xff]  ;;  %v4708_v0 = vld [vmem:[#allocation24_spill] sm:$0xff] }
 0x241   :  { %v3896_v16 = vpop.permute.xlu0 %1329  ;;  %v1088_v47 = vmul.f32 %v3269_v51, %v1064_v50  ;;  %v1089_v13 = vmul.f32 %v3288_v8, %v1068_v18  ;;  %v1182_v26 = vmul.f32 %v4695_v52, %v1162_v44  ;;  %v1183_v17 = vmul.f32 %v4696_v22, %v1158_v55 }
 0x242   :  { %v1043_v59 = vadd.f32 %v1035_v39, %v990_v41  ;;  %v1044_v63 = vadd.f32 %v1036_v57, %v991_v11  ;;  %v1008_v45 = vsel %vm483_vm14, %v4708_v0, %v4707_v43  ;;  %v1012_v50 = vsel %vm483_vm14, %v4707_v43, %v4708_v0  ;;  %v4709_v39 = vld [vmem:[#allocation32_spill] sm:$0xff]  ;;  %v4710_v57 = vld [vmem:[#allocation25_spill] sm:$0xff]  ;;  %v4720_v43 = vld [vmem:[#allocation79_spill] sm:$0xff] }
 0x243   :  { %v1029_v55 = vmul.f32 %v4680_v7, %v1008_v45  ;;  %v1030_v44 = vmul.f32 %v4681_v25, %v1012_v50  ;;  %v1061_v27 = vsel %vm537_vm15, %v4710_v57, %v4709_v39  ;;  %v1065_v33 = vsel %vm537_vm15, %v4709_v39, %v4710_v57  ;;  %v4721_v45 = vld [vmem:[#allocation17_spill] sm:$0xff]  ;;  %v4722_v50 = vld [vmem:[#allocation80_spill] sm:$0xff]  ;;  %v4723_v39 = vld [vmem:[#allocation62_spill] sm:$0xff] }
 0x244   :  { %v1096_v42 = vadd.f32 %v1088_v47, %v1043_v59  ;;  %v1097_v58 = vadd.f32 %v1089_v13, %v1044_v63  ;;  %v1197_v37 = vpop.permute.xlu1 %1196  ;;  %v1082_v7 = vmul.f32 %v3269_v51, %v1061_v27  ;;  %v1083_v25 = vmul.f32 %v3288_v8, %v1065_v33  ;;  %v4711_v59 = vld [vmem:[#allocation41_spill] sm:$0xff]  ;;  %v4712_v63 = vld [vmem:[#allocation54_spill] sm:$0xff]  ;;  %v4724_v57 = vld [vmem:[#allocation44_spill] sm:$0xff] }
 0x245   :  { %v3902_v53 = vpop.permute.xlu0 %1337  ;;  %v1037_v11 = vadd.f32 %v1029_v55, %v984_v30  ;;  %v1038_v13 = vadd.f32 %v1030_v44, %v985_v28  ;;  %v1259_v55 = vmul.f32 %v4722_v50, %v4721_v45  ;;  %v1294_v27 = vsel %vm483_vm14, %v4723_v39, %v4724_v57 }
 0x246   :  { %v1190_v14 = vadd.f32 %v1182_v26, %v1096_v42  ;;  %v1191_v36 = vadd.f32 %v1183_v17, %v1097_v58  ;;  %v1159_v42 = vsel %vm355_vm12, %v4712_v63, %v4711_v59  ;;  %v1155_v26 = vsel %vm355_vm12, %v4711_v59, %v4712_v63  ;;  %v2010_v59 = vld [vmem:[%s4395_s5 + $0x24] ss:$8 sm:$0x3]  ;;  %v4727_v63 = vld [vmem:[#allocation69_spill] sm:$0xff] }
 0x247   :  { %v1090_v30 = vadd.f32 %v1082_v7, %v1037_v11  ;;  %v1091_v28 = vadd.f32 %v1083_v25, %v1038_v13  ;;  %v1176_v51 = vmul.f32 %v4695_v52, %v1159_v42  ;;  %v1177_v8 = vmul.f32 %v4696_v22, %v1155_v26  ;;  %v4725_v11 = vld [vmem:[#allocation49_spill] sm:$0xff]  ;;  %v4728_v26 = vld [vmem:[#allocation71_spill] sm:$0xff] }
 0x248   :  { %v1205_v15 = vpop.permute.xlu1 %1204  ;;  %v4018_v13 = vmul.f32 %v4720_v43, %v4725_v11  ;;  %v4027_v42 = vmul.f32 %v4722_v50, %v4727_v63  ;;  %v2014_v11 = vld [vmem:[%s4395_s5 + $0x30] ss:$8 sm:$0x3]  ;;  %v1347_v29 = vsel %vm537_vm15, %v3894_v3, %v3866_v48 }
 0x249   :  { %v1210_v10 = vsel %vm400_vm13, %v1197_v37, %v1205_v15  ;;  %v1214_v46 = vsel %vm400_vm13, %v1205_v15, %v1197_v37  ;;  %v1199_v4 = vpop.permute.xlu0 %1198  ;;  %v4713_v37 = vld [vmem:[#allocation42_spill] sm:$0xff]  ;;  %v1185_v22 = vadd.f32 %v1177_v8, %v1091_v28  ;;  %v4729_v28 = vld [vmem:[#allocation73_spill] sm:$0xff] }
 0x24a   :  { %v1233_v19 = vmul.f32 %v4705_v6, %v1214_v46  ;;  %v1234_v2 = vmul.f32 %v4706_v23, %v1210_v10  ;;  %v2012_v10 = vld [vmem:[%s4395_s5 + $0x26] ss:$8 sm:$0x3]  ;;  %v2011_v8 = vld [vmem:[%s4395_s5 + $0x25] ss:$8 sm:$0x3] }
 0x24c   :  { %v3910_v20 = vpop.permute.xlu1 %1421  ;;  %v3912_v49 = vadd.f32 %v1233_v19, %v1188_v21  ;;  %v3914_v62 = vadd.f32 %v1234_v2, %v1189_v60  ;;  %v4715_v2 = vld [vmem:[#allocation2_spill] sm:$0xff] }
 0x24d   :  { %v1207_v24 = vpop.permute.xlu0 %1206 }
 0x24e   :  { %v1211_v54 = vsel %vm400_vm13, %v1199_v4, %v1207_v24  ;;  %v1215_v35 = vsel %vm400_vm13, %v1207_v24, %v1199_v4  ;;  %v1184_v4 = vadd.f32 %v1176_v51, %v1090_v30  ;;  %v3993_v24 = vrot.slane %v2012_v10, %v4715_v2 }
 0x24f   :  { %v1235_v56 = vmul.f32 %v4705_v6, %v1215_v35  ;;  %v1236_v1 = vmul.f32 %v4706_v23, %v1211_v54  ;;  %v4717_v54 = vld [vmem:[#allocation3_spill] sm:$0xff]  ;;  %v4031_v30 = vmul.f32 %v4720_v43, %v4728_v26  ;;  %v4035_v51 = vmul.f32 %v4722_v50, %v4729_v28 }
 0x250   :  { %v3922_v9 = vpop.permute.xlu1 %1429  ;;  %4716 = vst [vmem:[#allocation14_spill] sm:$0xff] %v3993_v24  ;;  %v3996_v35 = vrot.slane %v2012_v10, %v4717_v54  ;;  %v4071_v63 = vmul.f32 %v3993_v24, %v3487_v12  ;;  %v4077_v26 = vrot.slane %v2010_v59, %v4715_v2  ;;  %v4080_v28 = vrot.slane %v2010_v59, %v4717_v54 }
 0x251   :  { %v3924_v31 = vadd.f32 %v1235_v56, %v1190_v14  ;;  %v3926_v61 = vadd.f32 %v1236_v1, %v1191_v36  ;;  %v3928_v21 = vpop.permute.xlu0 %1423  ;;  %v4714_v14 = vld [vmem:[#allocation59_spill] sm:$0xff]  ;;  %v4719_v1 = vld [vmem:[#allocation16_spill] sm:$0xff]  ;;  %v1344_v12 = vsel %vm537_vm15, %v3896_v16, %v3902_v53 }
 0x252   :  { %v1212_v36 = vsel %vm400_vm13, %v4714_v14, %v4713_v37  ;;  %v1208_v46 = vsel %vm400_vm13, %v4713_v37, %v4714_v14  ;;  %4718 = vst [vmem:[#allocation37_spill] sm:$0xff] %v3996_v35  ;;  %v1258_v0 = vmul.f32 %v4720_v43, %v4719_v1  ;;  %v4730_v37 = vld [vmem:[#allocation75_spill] sm:$0xff]  ;;  %v4735_v43 = vld [vmem:[#allocation46_spill] sm:$0xff]  ;;  %4736 = vst [vmem:[#allocation39_spill] sm:$0xff] %v4071_v63 }
 0x253   :  { %v1229_v19 = vmul.f32 %v4705_v6, %v1212_v36  ;;  %v1230_v56 = vmul.f32 %v4706_v23, %v1208_v46  ;;  %v1290_v6 = vsel %vm483_vm14, %v4724_v57, %v4723_v39  ;;  %v2009_v23 = vld [vmem:[%s4395_s5 + $0x23] ss:$8 sm:$0x3]  ;;  %v4042_v14 = vmul.f32 %v3993_v24, %v4730_v37  ;;  %v4731_v36 = vld [vmem:[#allocation76_spill] sm:$0xff]  ;;  %v4732_v46 = vld [vmem:[#allocation9_spill] sm:$0xff]  ;;  %4738 = vst [vmem:[#allocation43_spill] sm:$0xff] %v4077_v26 }
 0x254   :  { %v3930_v60 = vpop.permute.xlu1 %1474  ;;  %v4046_v10 = vmul.f32 %v3996_v35, %v4731_v36  ;;  %v1312_v45 = vmul.f32 %v4735_v43, %v1294_v27  ;;  %v4059_v50 = vrot.slane %v2009_v23, %v4715_v2  ;;  %v2013_v57 = vld [vmem:[%s4395_s5 + $0x27] ss:$8 sm:$0x3]  ;;  %v4074_v27 = vrot.slane %v2009_v23, %v4717_v54  ;;  %4739 = vst [vmem:[#allocation45_spill] sm:$0xff] %v4080_v28  ;;  %v1662_v36 = vld [vmem:[%s4397_s7] sm:$0x3] }
 0x255   :  { %v3932_v34 = vpop.permute.xlu0 %1431  ;;  %v1237_v33 = vadd.f32 %v1229_v19, %v1184_v4  ;;  %v1238_v25 = vadd.f32 %v1230_v56, %v1185_v22  ;;  %v4050_v4 = vmul.f32 %v3993_v24, %v4732_v46  ;;  %v4733_v22 = vld [vmem:[#allocation10_spill] sm:$0xff]  ;;  %v4734_v56 = vld [vmem:[#allocation28_spill] sm:$0xff]  ;;  %v4098_v23 = vrot.slane %v2013_v57, %v4715_v2 }
 0x256   :  { %v4054_v19 = vmul.f32 %v3996_v35, %v4733_v22  ;;  %v1311_v1 = vmul.f32 %v4734_v56, %v1290_v6  ;;  %4737 = vst [vmem:[#allocation53_spill] sm:$0xff] %v4074_v27  ;;  %v4101_v59 = vrot.slane %v2013_v57, %v4717_v54  ;;  %v4104_v22 = vrot.slane %v2014_v11, %v4715_v2  ;;  %v1710_v63 = vld [vmem:[%s4399_s9] sm:$0x3] }
 0x257   :  { %v1266_v6 = vadd.f32 %v1258_v0, %v1237_v33  ;;  %v1267_v46 = vadd.f32 %v1259_v55, %v1238_v25  ;;  %v4092_v0 = vrot.slane %v2011_v8, %v4715_v2  ;;  %v4095_v33 = vrot.slane %v2011_v8, %v4717_v54 }
 0x258   :  { %v3938_v5 = vpop.permute.xlu1 %1482  ;;  %v4107_v55 = vrot.slane %v2014_v11, %v4717_v54  ;;  %v1343_v25 = vsel %vm537_vm15, %v3866_v48, %v3894_v3  ;;  %v1348_v8 = vsel %vm537_vm15, %v3902_v53, %v3896_v16  ;;  %v1441_v57 = vsel %vm355_vm12, %v3922_v9, %v3910_v20 }
 0x259   :  { %v3944_v18 = vpop.permute.xlu0 %1476  ;;  %v4122_v35 = vrot.slane %v1662_v36, %v4715_v2  ;;  %v1319_v11 = vadd.f32 %v1311_v1, %v1266_v6  ;;  %v1366_v24 = vmul.f32 %v4059_v50, %v1344_v12  ;;  %v1437_v16 = vsel %vm355_vm12, %v3910_v20, %v3922_v9 }
 0x25a   :  { %v1320_v38 = vadd.f32 %v1312_v45, %v1267_v46  ;;  %v1438_v1 = vsel %vm355_vm12, %v3928_v21, %v3932_v34  ;;  %v1442_v48 = vsel %vm355_vm12, %v3932_v34, %v3928_v21  ;;  %v1494_v3 = vsel %vm400_vm13, %v3938_v5, %v3930_v60 }
 0x25b   :  { %4741 = vst [vmem:[#allocation22_spill] sm:$0xff] %v4122_v35  ;;  %v1364_v20 = vmul.f32 %v4059_v50, %v1343_v25  ;;  %v1367_v9 = vmul.f32 %v4074_v27, %v1348_v8  ;;  %v1458_v45 = vmul.f32 %v4077_v26, %v1441_v57  ;;  %v1490_v6 = vsel %vm400_vm13, %v3930_v60, %v3938_v5 }
 0x25c   :  { %v3952_v41 = vpop.permute.xlu1 %1278  ;;  %v1365_v46 = vmul.f32 %v4074_v27, %v1347_v29  ;;  %v1459_v21 = vmul.f32 %v4080_v28, %v1437_v16  ;;  %v1460_v57 = vmul.f32 %v4077_v26, %v1442_v48  ;;  %v1461_v60 = vmul.f32 %v4080_v28, %v1438_v1  ;;  %v1682_v16 = vld [vmem:[%s4398_s8] sm:$0x3]  ;;  %v4743_v1 = vld [vmem:[#allocation65_spill] sm:$0xff] }
 0x25d   :  { %v3958_v47 = vpop.permute.xlu0 %1484  ;;  %v1372_v8 = vadd.f32 %v1364_v20, %v1319_v11  ;;  %v1511_v29 = vmul.f32 %v4092_v0, %v1494_v3  ;;  %v1512_v11 = vmul.f32 %v4095_v33, %v1490_v6  ;;  %v4178_v48 = vrot.slane %v1662_v36, %v4717_v54 }
 0x25e   :  { %v1491_v34 = vsel %vm400_vm13, %v3944_v18, %v3958_v47  ;;  %v1495_v12 = vsel %vm400_vm13, %v3958_v47, %v3944_v18  ;;  %v1373_v35 = vadd.f32 %v1365_v46, %v1320_v38  ;;  %v4742_v18 = vld [vmem:[#allocation35_spill] sm:$0xff]  ;;  %v1375_v20 = vadd.f32 %v1367_v9, %v4743_v1 }
 0x25f   :  { %v1374_v47 = vadd.f32 %v1366_v24, %v4742_v18  ;;  %v1466_v3 = vadd.f32 %v1458_v45, %v1372_v8  ;;  %v1513_v28 = vmul.f32 %v4092_v0, %v1495_v12  ;;  %v1514_v26 = vmul.f32 %v4095_v33, %v1491_v34 }
 0x260   :  { %v3966_v58 = vpop.permute.xlu1 %1286  ;;  %v4186_v27 = vrot.slane %v1682_v16, %v4715_v2  ;;  %v4189_v38 = vrot.slane %v1682_v16, %v4717_v54  ;;  %v4192_v24 = vrot.slane %v1710_v63, %v4715_v2  ;;  %v1469_v6 = vadd.f32 %v1461_v60, %v1375_v20 }
 0x261   :  { %v3972_v17 = vpop.permute.xlu0 %1280  ;;  %v1468_v36 = vadd.f32 %v1460_v57, %v1374_v47  ;;  %v1519_v9 = vadd.f32 %v1511_v29, %v1466_v3  ;;  %v4197_v46 = vrot.slane %v1710_v63, %v4717_v54  ;;  %v1271_v34 = vadd.f32 %v4027_v42, %v3914_v62 }
 0x262   :  { %v1522_v8 = vadd.f32 %v1514_v26, %v1469_v6  ;;  %v1292_v57 = vsel %vm483_vm14, %v3952_v41, %v3966_v58  ;;  %v1272_v62 = vadd.f32 %v4031_v30, %v3924_v31 }
 0x263   :  { %v1521_v12 = vadd.f32 %v1513_v28, %v1468_v36  ;;  %v1548_v31 = vadd.f32 %v4042_v14, %v1519_v9  ;;  %v1315_v30 = vmul.f32 %v4734_v56, %v1292_v57  ;;  %v4744_v36 = vld [vmem:[#allocation53_spill] sm:$0xff] }
 0x264   :  { %v3980_v15 = vpop.permute.xlu1 %1331  ;;  %v1551_v26 = vadd.f32 %v4054_v19, %v1522_v8 }
 0x265   :  { %v3989_v52 = vpop.permute.xlu0 %1288  ;;  %v1550_v14 = vadd.f32 %v4050_v4, %v1521_v12 }
 0x268   :  { %v4003_v44 = vpop.permute.xlu1 %1339 }
 0x269   :  { %v4020_v7 = vpop.permute.xlu0 %1333 }
 0x26a   :  { %4726 = vst [vmem:[#allocation52_spill] sm:$0xff] %v4020_v7  ;;  %v1467_v7 = vadd.f32 %v1459_v21, %v1373_v35  ;;  %v1270_v21 = vadd.f32 %v4018_v13, %v3912_v49  ;;  %v1296_v49 = vsel %vm483_vm14, %v3966_v58, %v3952_v41  ;;  %v1273_v13 = vadd.f32 %v4035_v51, %v3926_v61 }
 0x26b   :  { %v1345_v41 = vsel %vm537_vm15, %v3980_v15, %v4003_v44 }
 0x26c   :  { %v4061_v39 = vpop.permute.xlu1 %1556  ;;  %v1520_v35 = vadd.f32 %v1512_v11, %v1467_v7  ;;  %v1293_v7 = vsel %vm483_vm14, %v3972_v17, %v3989_v52  ;;  %v1368_v60 = vmul.f32 %v4059_v50, %v1345_v41 }
 0x26d   :  { %v4082_v37 = vpop.permute.xlu0 %1341  ;;  %v1317_v63 = vmul.f32 %v4734_v56, %v1293_v7  ;;  %v4747_v7 = vld [vmem:[#allocation43_spill] sm:$0xff] }
 0x26e   :  { %4740 = vst [vmem:[#allocation27_spill] sm:$0xff] %v4082_v37  ;;  %v1549_v51 = vadd.f32 %v4046_v10, %v1520_v35  ;;  %v1349_v10 = vsel %vm537_vm15, %v4003_v44, %v3980_v15 }
 0x26f   :  { %v1325_v1 = vadd.f32 %v1317_v63, %v1272_v62  ;;  %v1369_v6 = vmul.f32 %v4744_v36, %v1349_v10  ;;  %v4748_v62 = vld [vmem:[#allocation22_spill] sm:$0xff] }
 0x270   :  { %v1565_v32 = vpop.permute.xlu1 %1564 }
 0x271   :  { %v4133_v53 = vpop.permute.xlu0 %1558  ;;  %v1572_v2 = vsel %vm483_vm14, %v4061_v39, %v1565_v32  ;;  %v1576_v54 = vsel %vm483_vm14, %v1565_v32, %v4061_v39  ;;  %v1297_v32 = vsel %vm483_vm14, %v3989_v52, %v3972_v17  ;;  %v1316_v52 = vmul.f32 %v4735_v43, %v1296_v49  ;;  %v4746_v57 = vld [vmem:[#allocation52_spill] sm:$0xff] }
 0x272   :  { %v1593_v61 = vmul.f32 %v4098_v23, %v1572_v2  ;;  %v1594_v39 = vmul.f32 %v4101_v59, %v1576_v54  ;;  %v1318_v28 = vmul.f32 %v4735_v43, %v1297_v32 }
 0x273   :  { %v1324_v11 = vadd.f32 %v1316_v52, %v1271_v34 }
 0x274   :  { %v4164_v25 = vpop.permute.xlu1 %1425  ;;  %v1601_v18 = vadd.f32 %v1593_v61, %v1548_v31  ;;  %v1602_v47 = vadd.f32 %v1594_v39, %v1549_v51  ;;  %v4268_v3 = vadd.f32 %v1318_v28, %v1273_v13 }
 0x275   :  { %v1567_v5 = vpop.permute.xlu0 %1566  ;;  %v4745_v8 = vld [vmem:[#allocation27_spill] sm:$0xff] }
 0x276   :  { %v1573_v17 = vsel %vm483_vm14, %v4133_v53, %v1567_v5  ;;  %v1577_v29 = vsel %vm483_vm14, %v1567_v5, %v4133_v53  ;;  %v1323_v5 = vadd.f32 %v1315_v30, %v1270_v21  ;;  %v1346_v54 = vsel %vm537_vm15, %v4746_v57, %v4745_v8 }
 0x277   :  { %v1595_v56 = vmul.f32 %v4098_v23, %v1573_v17  ;;  %v1596_v20 = vmul.f32 %v4101_v59, %v1577_v29  ;;  %v1350_v39 = vsel %vm537_vm15, %v4745_v8, %v4746_v57  ;;  %v1370_v17 = vmul.f32 %v4059_v50, %v1346_v54  ;;  %v4749_v29 = vld [vmem:[#allocation45_spill] sm:$0xff] }
 0x278   :  { %v4183_v37 = vpop.permute.xlu1 %1433  ;;  %v1376_v12 = vadd.f32 %v1368_v60, %v1323_v5  ;;  %v1377_v60 = vadd.f32 %v1369_v6, %v1324_v11 }
 0x279   :  { %v4194_v45 = vpop.permute.xlu0 %1427  ;;  %v1443_v15 = vsel %vm355_vm12, %v4183_v37, %v4164_v25  ;;  %v1603_v49 = vadd.f32 %v1595_v56, %v1550_v14  ;;  %v1604_v31 = vadd.f32 %v1596_v20, %v1551_v26  ;;  %v1439_v61 = vsel %vm355_vm12, %v4164_v25, %v4183_v37 }
 0x27a   :  { %v1462_v21 = vmul.f32 %v4747_v7, %v1443_v15  ;;  %v1371_v56 = vmul.f32 %v4744_v36, %v1350_v39 }
 0x27c   :  { %v1610_v42 = vpop.permute.xlu1 %1609  ;;  %v1470_v50 = vadd.f32 %v1462_v21, %v1376_v12 }
 0x27d   :  { %v4235_v58 = vpop.permute.xlu0 %1435 }
 0x27e   :  { %v1444_v52 = vsel %vm355_vm12, %v4235_v58, %v4194_v45 }
 0x280   :  { %v1618_v16 = vpop.permute.xlu1 %1617 }
 0x281   :  { %v1625_v4 = vsel %vm537_vm15, %v1610_v42, %v1618_v16  ;;  %v1629_v19 = vsel %vm537_vm15, %v1618_v16, %v1610_v42  ;;  %v1612_v43 = vpop.permute.xlu0 %1611  ;;  %v1463_v16 = vmul.f32 %v4749_v29, %v1439_v61 }
 0x282   :  { %v1646_v44 = vmul.f32 %v4104_v22, %v1625_v4  ;;  %v1647_v53 = vmul.f32 %v4107_v55, %v1629_v19  ;;  %v1464_v4 = vmul.f32 %v4747_v7, %v1444_v52 }
 0x284   :  { %v1654_v9 = vadd.f32 %v1646_v44, %v1601_v18  ;;  %v1655_v35 = vadd.f32 %v1647_v53, %v1602_v47  ;;  %v1479_v2 = vpop.permute.xlu1 %1478  ;;  %v1378_v47 = vadd.f32 %v1370_v17, %v1325_v1  ;;  %v1440_v1 = vsel %vm355_vm12, %v4194_v45, %v4235_v58 }
 0x285   :  { %v1620_v34 = vpop.permute.xlu0 %1619  ;;  %v1465_v61 = vmul.f32 %v4749_v29, %v1440_v1 }
 0x286   :  { %v1674_v42 = vmul.f32 %v4748_v62, %v1654_v9  ;;  %v1675_v13 = vmul.f32 %v4178_v48, %v1655_v35  ;;  %v1626_v32 = vsel %vm537_vm15, %v1612_v43, %v1620_v34  ;;  %v1630_v41 = vsel %vm537_vm15, %v1620_v34, %v1612_v43 }
 0x287   :  { %v1648_v30 = vmul.f32 %v4104_v22, %v1626_v32  ;;  %v1649_v51 = vmul.f32 %v4107_v55, %v1630_v41  ;;  %v1471_v9 = vadd.f32 %v1463_v16, %v1377_v60  ;;  %v4753_v60 = vld [vmem:[#allocation47_spill] sm:$0xff]  ;;  %v4754_v16 = vld [vmem:[#allocation37_spill] sm:$0xff] }
 0x288   :  { %v1487_v63 = vpop.permute.xlu1 %1486  ;;  %v1695_v14 = vadd.f32 %v4189_v38, %v1675_v13  ;;  %v1694_v37 = vadd.f32 %v4186_v27, %v1674_v42  ;;  %v1545_v29 = vmul.f32 %v4754_v16, %v4753_v60 }
 0x289   :  { %v1656_v25 = vadd.f32 %v1648_v30, %v1603_v49  ;;  %v1657_v26 = vadd.f32 %v1649_v51, %v1604_v31  ;;  %v1496_v28 = vsel %vm400_vm13, %v1487_v63, %v1479_v2  ;;  %v1481_v10 = vpop.permute.xlu0 %1480  ;;  %v1492_v15 = vsel %vm400_vm13, %v1479_v2, %v1487_v63 }
 0x28a   :  { %v1515_v18 = vmul.f32 %v4092_v0, %v1496_v28  ;;  %v1723_v5 = vmul.f32 %v4197_v46, %v1695_v14  ;;  %vm1703_vm0 = vcmp.gt.f32.partialorder %v1695_v14, 0.0  ;;  %v1722_v36 = vmul.f32 %v4192_v24, %v1694_v37 }
 0x28b   :  { %v1676_v19 = vmul.f32 %v4748_v62, %v1656_v25  ;;  %v1677_v43 = vmul.f32 %v4178_v48, %v1657_v26  ;;  %vm1702_vm1 = vcmp.gt.f32.partialorder %v1694_v37, 0.0  ;;  %v1472_v2 = vadd.f32 %v1464_v4, %v1378_v47  ;;  %v4751_v25 = vld [vmem:[#allocation36_spill] sm:$0xff]  ;;  %v4752_v26 = vld [vmem:[#allocation14_spill] sm:$0xff] }
 0x28c   :  { %v1523_v44 = vadd.f32 %v1515_v18, %v1470_v50  ;;  %v1561_v53 = vpop.permute.xlu1 %1560  ;;  %v1516_v57 = vmul.f32 %v4095_v33, %v1492_v15  ;;  %v1731_v49 = vsel %vm1703_vm0, %v1695_v14, %v1723_v5  ;;  %v1730_v42 = vsel %vm1702_vm1, %v1694_v37, %v1722_v36 }
 0x28d   :  { %v1696_v11 = vadd.f32 %v4186_v27, %v1676_v19  ;;  %v1489_v20 = vpop.permute.xlu0 %1488  ;;  %v1697_v6 = vadd.f32 %v4189_v38, %v1677_v43  ;;  %v1379_v14 = vadd.f32 %v1371_v56, %v4268_v3  ;;  %v1546_v28 = vmul.f32 %v4752_v26, %v4751_v25  ;;  %v2140_v25 = vld [vmem:[%s4391_s0] sm:$0xff]  }
 0x28e   :  { %v1497_v35 = vsel %vm400_vm13, %v1489_v20, %v1481_v10  ;;  %v1493_v45 = vsel %vm400_vm13, %v1481_v10, %v1489_v20  ;;  %v1524_v17 = vadd.f32 %v1516_v57, %v1471_v9  ;;  %v1941_v26 = vunpack.c.l.bf16 %v2140_v25 }
 0x28f   :  { %v1517_v12 = vmul.f32 %v4092_v0, %v1497_v35  ;;  %vm1705_vm2 = vcmp.gt.f32.partialorder %v1697_v6, 0.0  ;;  %v1725_v8 = vmul.f32 %v4197_v46, %v1697_v6  ;;  %vm1704_vm3 = vcmp.gt.f32.partialorder %v1696_v11, 0.0  ;;  %v4750_v0 = vld [vmem:[#allocation39_spill] sm:$0xff] }
 0x290   :  { %v1569_v54 = vpop.permute.xlu1 %1568  ;;  %v1724_v7 = vmul.f32 %v4192_v24, %v1696_v11  ;;  %v1552_v13 = vadd.f32 %v4750_v0, %v1523_v44  ;;  %v1518_v37 = vmul.f32 %v4095_v33, %v1493_v45  ;;  %v1473_v4 = vadd.f32 %v1465_v61, %v1379_v14 }
 0x291   :  { %v1525_v58 = vadd.f32 %v1517_v12, %v1472_v2  ;;  %v1574_v21 = vsel %vm483_vm14, %v1561_v53, %v1569_v54  ;;  %v1563_v34 = vpop.permute.xlu0 %1562  ;;  %v1733_v41 = vsel %vm1705_vm2, %v1697_v6, %v1725_v8  ;;  %v1578_v30 = vsel %vm483_vm14, %v1569_v54, %v1561_v53 }
 0x292   :  { %v1597_v32 = vmul.f32 %v4098_v23, %v1574_v21  ;;  %v1732_v31 = vsel %vm1704_vm3, %v1696_v11, %v1724_v7  ;;  %v1739_v51 = vpack.c.bf16 %v1733_v41, %v1731_v49  ;;  %v1598_v50 = vmul.f32 %v4101_v59, %v1578_v30 }
 0x293   :  { %v1738_v39 = vpack.c.bf16 %v1732_v31, %v1730_v42  ;;  %v1554_v19 = vadd.f32 %v1546_v28, %v1525_v58  ;;  %v1553_v56 = vadd.f32 %v1545_v29, %v1524_v17  ;;  %v1526_v47 = vadd.f32 %v1518_v37, %v1473_v4  ;;  %v2031_v17 = vld [vmem:[%s4400_s11] ss:$0 sm:$0xff] }
 0x294   :  { %v1605_v52 = vadd.f32 %v1597_v32, %v1552_v13  ;;  %v1614_v63 = vpop.permute.xlu1 %1613  ;;  %1902 = vmatprep.mubr.bf16.mxu1 %v1739_v51  ;;  %v1942_v28 = vunpack.c.h.bf16 %v2140_v25 }
 0x295   :  { %v1571_v10 = vpop.permute.xlu0 %1570  ;;  %1903 = vmatmul.mubr.bf16.vlgmr.msra.gmra.mxu1 %v1738_v39  ;;  %v1606_v11 = vadd.f32 %v1598_v50, %v1553_v56 }
 0x296   :  { %v1575_v18 = vsel %vm483_vm14, %v1563_v34, %v1571_v10  ;;  %v1579_v33 = vsel %vm483_vm14, %v1571_v10, %v1563_v34 }
 0x297   :  { %v1599_v3 = vmul.f32 %v4098_v23, %v1575_v18  ;;  %v4755_v23 = vld [vmem:[#allocation66_spill] sm:$0xff]  ;;  %v1600_v9 = vmul.f32 %v4101_v59, %v1579_v33 }
 0x298   :  { %v1622_v43 = vpop.permute.xlu1 %1621  ;;  %v1547_v36 = vmul.f32 %v4754_v16, %v4755_v23 }
 0x299   :  { %v1607_v15 = vadd.f32 %v1599_v3, %v1554_v19  ;;  %v1627_v44 = vsel %vm537_vm15, %v1614_v63, %v1622_v43  ;;  %v1631_v53 = vsel %vm537_vm15, %v1622_v43, %v1614_v63  ;;  %v1616_v5 = vpop.permute.xlu0 %1615 }
 0x29a   :  { %v1650_v20 = vmul.f32 %v4104_v22, %v1627_v44  ;;  %v1651_v6 = vmul.f32 %v4107_v55, %v1631_v53  ;;  %v1555_v2 = vadd.f32 %v1547_v36, %v1526_v47 }
 0x29c   :  { %v1658_v1 = vadd.f32 %v1650_v20, %v1605_v52  ;;  %v1659_v35 = vadd.f32 %v1651_v6, %v1606_v11  ;;  %v1608_v7 = vadd.f32 %v1600_v9, %v1555_v2 }
 0x29d   :  { %v1624_v12 = vpop.permute.xlu0 %1623 }
 0x29e   :  { %v1678_v8 = vmul.f32 %v4748_v62, %v1658_v1  ;;  %v1679_v57 = vmul.f32 %v4178_v48, %v1659_v35  ;;  %v1628_v54 = vsel %vm537_vm15, %v1616_v5, %v1624_v12  ;;  %v1632_v49 = vsel %vm537_vm15, %v1624_v12, %v1616_v5 }
 0x29f   :  { %v1652_v45 = vmul.f32 %v4104_v22, %v1628_v54  ;;  %v1653_v58 = vmul.f32 %v4107_v55, %v1632_v49 }
 0x2a0   :  { %v1698_v59 = vadd.f32 %v4186_v27, %v1678_v8  ;;  %v1699_v21 = vadd.f32 %v4189_v38, %v1679_v57 }
 0x2a1   :  { %v1660_v34 = vadd.f32 %v1652_v45, %v1607_v15  ;;  %v1661_v42 = vadd.f32 %v1653_v58, %v1608_v7  ;;  %v2141_v15 = vld [vmem:[%s4391_s0 + $0x8] sm:$0xff]  }
 0x2a2   :  { %v1727_v41 = vmul.f32 %v4197_v46, %v1699_v21  ;;  %v1726_v22 = vmul.f32 %v4192_v24, %v1698_v59  ;;  %vm1707_vm4 = vcmp.gt.f32.partialorder %v1699_v21, 0.0  ;;  %vm1706_vm5 = vcmp.gt.f32.partialorder %v1698_v59, 0.0 }
 0x2a3   :  { %v1680_v0 = vmul.f32 %v4748_v62, %v1660_v34  ;;  %v1681_v13 = vmul.f32 %v4178_v48, %v1661_v42  ;;  %v1943_v44 = vunpack.c.l.bf16 %v2141_v15  ;;  %v1944_v53 = vunpack.c.h.bf16 %v2141_v15 }
 0x2a4   :  { %v1735_v61 = vsel %vm1707_vm4, %v1699_v21, %v1727_v41  ;;  %v1734_v30 = vsel %vm1706_vm5, %v1698_v59, %v1726_v22 }
 0x2a5   :  { %v1700_v32 = vadd.f32 %v4186_v27, %v1680_v0  ;;  %v1701_v40 = vadd.f32 %v4189_v38, %v1681_v13 }
 0x2a7   :  { %vm1709_vm6 = vcmp.gt.f32.partialorder %v1701_v40, 0.0  ;;  %v1729_v55 = vmul.f32 %v4197_v46, %v1701_v40  ;;  %vm1708_vm7 = vcmp.gt.f32.partialorder %v1700_v32, 0.0  ;;  %v1728_v31 = vmul.f32 %v4192_v24, %v1700_v32  ;;  %v2032_v24 = vld [vmem:[%s4401_s12] ss:$0 sm:$0xff] }
 0x2a9   :  { %v1737_v62 = vsel %vm1709_vm6, %v1701_v40, %v1729_v55  ;;  %v1736_v48 = vsel %vm1708_vm7, %v1700_v32, %v1728_v31 }
 0x2aa   :  { %v1741_v51 = vpack.c.bf16 %v1737_v62, %v1735_v61  ;;  %v1740_v27 = vpack.c.bf16 %v1736_v48, %v1734_v30 }
 0x2ac   :  { %1910 = vmatprep.mubr.bf16.mxu1 %v1741_v51 }
 0x2ad   :  { %1911 = vmatmul.mubr.bf16.gmra.mxu1 %v1740_v27 }
 0x355   :  { %v2068_v38 = vpop.f32.mrf.mxu1 }
 0x357   :  { %v2069_v39 = vpop.f32.mrf.mxu1 }
 0x358   :  { %v2070_v52 = vadd.f32 %v2069_v39, %v2068_v38 }
 0x359   :  { %v2071_v63 = vpop.f32.mrf.mxu1 }
 0x35a   :  { %v1926_v46 = vmul.f32 %v2070_v52, %v2031_v17 }
 0x35b   :  { %v2072_v14 = vpop.f32.mrf.mxu1 }
 0x35c   :  { %v2073_v37 = vadd.f32 %v2072_v14, %v2071_v63  ;;  %v1937_v10 = vadd.f32 %v2032_v24, %v1926_v46 }
 0x35e   :  { %v1927_v60 = vmul.f32 %v2073_v37, %v2031_v17  ;;  %v1945_v29 = vadd.f32 %v1941_v26, %v1937_v10 }
 0x360   :  { %v1938_v16 = vadd.f32 %v2032_v24, %v1927_v60 }
 0x362   :  { %v1946_v50 = vadd.f32 %v1942_v28, %v1938_v16 }
 0x364   :  { %v2044_v18 = vpack.c.bf16 %v1946_v50, %v1945_v29 }
 0x366   :  { %2045 = vst [vmem:[%s4402_s13] sm:$0xff] %v2044_v18  }
 0x36d   :  { %v2074_v4 = vpop.f32.mrf.mxu1 }
 0x36f   :  { %v2075_v19 = vpop.f32.mrf.mxu1 }
 0x370   :  { %v2076_v3 = vadd.f32 %v2075_v19, %v2074_v4 }
 0x371   :  { %v2077_v56 = vpop.f32.mrf.mxu1 }
 0x372   :  { %v1928_v33 = vmul.f32 %v2076_v3, %v2031_v17 }
 0x373   :  { %v2078_v43 = vpop.f32.mrf.mxu1 }
 0x374   :  { %v2079_v47 = vadd.f32 %v2078_v43, %v2077_v56  ;;  %v1939_v5 = vadd.f32 %v2032_v24, %v1928_v33 }
 0x376   :  { %v1929_v11 = vmul.f32 %v2079_v47, %v2031_v17  ;;  %v1947_v6 = vadd.f32 %v1943_v44, %v1939_v5 }
 0x378   :  { %v1940_v20 = vadd.f32 %v2032_v24, %v1929_v11 }
 0x37a   :  { %v1948_v23 = vadd.f32 %v1944_v53, %v1940_v20 }
 0x37c   :  { %v2049_v36 = vpack.c.bf16 %v1948_v23, %v1947_v6 }
 0x37e   :  { %2051 = vst [vmem:[%s4402_s13 + $0x8] sm:$0xff] %v2049_v36  }

</bundles_post_ra>
